<compile_context>
chip_gen: v7x
topology: tpu7x:2x2x1
jax: 0.10.0
libtpu: 0.0.40
codegen_flags: <defaults>
</compile_context>

<pallas_src>
import jax
import jax.numpy as jnp
from jax.experimental import pallas as pl
from jax.experimental.pallas import tpu as pltpu

# ---- config defaults (EnhancedSpikeControlLoss.__init__ with empty config) ----
MAX_GRADIENT_THRESHOLD = 0.12
GRADIENT_WEIGHT = 0.25
HOMOGENEOUS_PENALTY = 3.0
TRANSITION_PENALTY = 0.4
SPIKE_THRESHOLD = 2.5
TEMPORAL_WEIGHT = 0.08
HIGH_VALUE_BOOST = 1.2
SCALING_THRESHOLD = 50000.0
WINDOW_SIZE = 15
VARIANCE_THRESHOLD = 0.05


def _left_window_sum16(a, L):
    """r[:, j] = sum_{k=0..15} a[:, (j+k) mod L] via log-step doubling (4 rolls)."""
    r = a + pltpu.roll(a, shift=L - 1, axis=1)
    r = r + pltpu.roll(r, shift=L - 2, axis=1)
    r = r + pltpu.roll(r, shift=L - 4, axis=1)
    r = r + pltpu.roll(r, shift=L - 8, axis=1)
    return r


def _masked_lower_median(x_masked, k, ones_bmj):
    """torch.median (lower of the two middle values) over the finite entries of
    each row of x_masked ([B, L] f32, invalid entries = +inf), via rank counting.
    The O(L^2) rank count is done as a batched matmul on the MXU (ones_bmj is a
    [B, 8, L] f32 ones operand). Returns [B, 1] f32."""
    # cmp[b, j, i] = (x[b, j] <= x[b, i]); for valid i, +inf rows never count.
    cmp = (x_masked[:, :, None] <= x_masked[:, None, :]).astype(jnp.float32)
    # cnt_le[b, m, i] = #{ j : x[b, j] <= x[b, i] }  (identical across m)
    cnt_le = jnp.einsum('bmj,bji->bmi', ones_bmj, cmp,
                        preferred_element_type=jnp.float32)           # [B, 8, L]
    cand = jnp.where(cnt_le >= float(k + 1), x_masked[:, None, :], jnp.inf)
    return jnp.min(jnp.min(cand, axis=-1), axis=-1, keepdims=True)    # [B, 1]


def _adaptive_window_loss_kernel(pred_ref, true_ref, out_ref):
    pred = pred_ref[...].astype(jnp.float32)   # [B, L]
    true = true_ref[...].astype(jnp.float32)   # [B, L]
    B, L = pred.shape
    W = WINDOW_SIZE
    M = L - 2                                  # valid second-difference count
    k_med = (M - 1) // 2                       # 0-based order statistic (lower median)

    col = jax.lax.broadcasted_iota(jnp.int32, (B, L), 1)
    valid1 = col <= L - 2                      # first-difference lanes
    valid2 = col <= L - 3                      # second-difference lanes
    m1 = valid1.astype(jnp.float32)
    m2 = valid2.astype(jnp.float32)

    # ---------------- high-value boost ----------------
    any_high = jnp.max(true) > SCALING_THRESHOLD
    high_mask = true > SCALING_THRESHOLD
    trans_mask = (true > SCALING_THRESHOLD * 0.8) & (true <= SCALING_THRESHOLD)
    trans_factor = 1.0 + (HIGH_VALUE_BOOST - 1.0) * (
        (true - SCALING_THRESHOLD * 0.8) / (SCALING_THRESHOLD * 0.2))
    boosted_full = jnp.where(high_mask, pred * HIGH_VALUE_BOOST, pred)
    boosted_full = jnp.where(trans_mask, pred * trans_factor, boosted_full)
    boosted = jnp.where(any_high, boosted_full, pred)

    # ---------------- lane-aligned differences (roll + mask, no slices) ------
    bs1 = pltpu.roll(boosted, shift=L - 1, axis=1)       # boosted[:, j+1]
    ts1 = pltpu.roll(true, shift=L - 1, axis=1)          # true[:, j+1]
    fd_b = bs1 - boosted                                 # valid j <= L-2
    fd_t = ts1 - true                                    # valid j <= L-2
    sd = pltpu.roll(fd_b, shift=L - 1, axis=1) - fd_b    # valid j <= L-3
    pd = jnp.abs(fd_b)                                   # |pred diffs|
    td = jnp.abs(fd_t)                                   # |true diffs|

    # ---------------- homogeneous zones: one-pass sliding variance ----------
    # Pre-center rows so Σx² − (Σx)²/W is numerically safe at impedance scale.
    xc = true - jnp.mean(true, axis=1, keepdims=True)
    x2 = xc * xc
    s15 = _left_window_sum16(xc, L) - pltpu.roll(xc, shift=L - W, axis=1)
    q15 = _left_window_sum16(x2, L) - pltpu.roll(x2, shift=L - W, axis=1)
    # lvar[:, j] = unbiased var of true[:, j:j+15], valid for j in [0, L-15]
    lvar = jnp.maximum((q15 - s15 * s15 * (1.0 / W)) * (1.0 / (W - 1)), 0.0)

    pad_left = W // 2                  # 7
    pad_right = W - pad_left - 1       # 7
    var_c = pltpu.roll(lvar, shift=pad_left, axis=1)     # lvar[:, j-7]
    left_col = lvar[:, 0:1]
    right_col = lvar[:, L - W:L - W + 1]
    padded_var = jnp.where(col < pad_left, left_col,
                           jnp.where(col > L - 1 - pad_right, right_col, var_c))
    max_var = jnp.max(padded_var, axis=1, keepdims=True)
    # normalized_var < thr  <=>  padded_var < thr * (max_var + 1e-8)
    homog_f = (padded_var < VARIANCE_THRESHOLD * (max_var + 1e-8)).astype(jnp.float32)
    zf = pltpu.roll(homog_f, shift=L - 1, axis=1)        # homog[:, j+1], valid j <= L-2

    # ---------------- spike detection (MAD-based, medians on MXU) -----------
    ones_bmj = jnp.ones((B, 8, L), jnp.float32)
    abs_sd_m = jnp.where(valid2, jnp.abs(sd), jnp.inf)
    med = _masked_lower_median(abs_sd_m, k_med, ones_bmj)            # [B, 1]
    dev_m = jnp.where(valid2, jnp.abs(sd - med), jnp.inf)
    mad = _masked_lower_median(dev_m, k_med, ones_bmj)               # [B, 1]
    threshold = med + SPIKE_THRESHOLD * mad
    det = jnp.where(valid2, (jnp.abs(sd) > threshold).astype(jnp.float32), 0.0)
    # dilation == max_pool1d(kernel=3, stride=1, padding=1); zero padding is free
    # because det is already 0 outside the valid region (wrap lanes hit zeros).
    dil_sum = det + pltpu.roll(det, shift=1, axis=1) + pltpu.roll(det, shift=L - 1, axis=1)
    spike_w = jnp.where(valid2, (dil_sum > 0.0).astype(jnp.float32), 0.0)

    # ---------------- fused static-denominator loss terms (one reduce) ------
    thr_t = jnp.maximum(td, MAX_GRADIENT_THRESHOLD)
    hom_grad = pd * zf
    excess = jnp.maximum(pd * (1.0 - zf) - 1.5 * thr_t, 0.0)
    inv_bl = 1.0 / (B * L)
    inv_bl1 = 1.0 / (B * (L - 1))
    inv_bl2 = 1.0 / (B * (L - 2))
    contrib = ((boosted - true) ** 2) * inv_bl \
        + m1 * ((pd - td) ** 2 * (0.3 * inv_bl1)
                + hom_grad * hom_grad * (HOMOGENEOUS_PENALTY * GRADIENT_WEIGHT * inv_bl1)
                + excess * excess * (TRANSITION_PENALTY * GRADIENT_WEIGHT * inv_bl1)) \
        + m2 * (sd * sd) * (TEMPORAL_WEIGHT * inv_bl2)
    total_static = jnp.sum(contrib)

    # ---------------- data-dependent mean terms (spike / preservation) ------
    sq1 = (bs1 - ts1) ** 2                       # (boosted[j+1] - true[j+1])^2
    tp_w = m1 * (1.0 - zf)                       # transition (non-homogeneous) lanes
    spike_cnt = jnp.sum(spike_w)
    spike_num = jnp.sum(sq1 * spike_w)
    tp_cnt = jnp.sum(tp_w)
    tp_num = jnp.sum(sq1 * tp_w)
    spike_term = jnp.where(spike_cnt > 0.0,
                           spike_num / jnp.maximum(spike_cnt, 1.0) * (5.0 * 0.8), 0.0)
    tp_term = jnp.where(tp_cnt > 0.0,
                        tp_num / jnp.maximum(tp_cnt, 1.0) * 0.5, 0.0)

    total = total_static + spike_term + tp_term
    out_ref[...] = jnp.broadcast_to(total, (1, 1)).astype(jnp.float32)


def adaptive_window_loss(impedance_pred, impedance_true):
    """AdaptiveWindowLoss.forward (adaptive_windows=True dispatches to the
    EnhancedSpikeControlLoss).  Inputs: [batch, seq] float32.  Returns scalar.
    If many loss evaluations are needed per step, stack them and add a leading
    'parallel' grid axis (second TensorCore on v7x) — single-problem call here."""
    pred = impedance_pred.astype(jnp.float32)
    true = impedance_true.astype(jnp.float32)
    B, L = pred.shape
    if L == 1:
        # torch early-exit path: plain MSE
        return jnp.mean((pred - true) ** 2)
    assert L > WINDOW_SIZE, "kernel implements the full path (seq_len > 15)"
    # TODO(synk): intermediate 1 < seq_len <= 15 torch paths not implemented.
    out = pl.pallas_call(
        _adaptive_window_loss_kernel,
        out_shape=jax.ShapeDtypeStruct((1, 1), jnp.float32),
        in_specs=[pl.BlockSpec(memory_space=pltpu.MemorySpace.VMEM),
                  pl.BlockSpec(memory_space=pltpu.MemorySpace.VMEM)],
        out_specs=pl.BlockSpec(memory_space=pltpu.MemorySpace.VMEM),
    )(pred, true)
    return out[0, 0]


if __name__ == "__main__":
    key = jax.random.PRNGKey(0)
    k1, k2 = jax.random.split(key)
    B, L = 4, 64
    # impedance-like magnitudes so the high-value-boost / transition paths are exercised
    impedance_true = 35000.0 + 25000.0 * jax.random.uniform(k1, (B, L), dtype=jnp.float32)
    impedance_pred = impedance_true + 500.0 * jax.random.normal(k2, (B, L), dtype=jnp.float32)

    loss = jax.jit(adaptive_window_loss)(impedance_pred, impedance_true)
    jax.block_until_ready(loss)
    print("KERNEL_OK")
</pallas_src>

<mosaic_0001>
module attributes {stable_mosaic.version = 11 : i64} {
  func.func @_adaptive_window_loss_kernel(%arg0: memref<4x64xf32, #tpu.memory_space<vmem>>, %arg1: memref<4x64xf32, #tpu.memory_space<vmem>>, %arg2: memref<1x1xf32, #tpu.memory_space<vmem>>) attributes {dimension_semantics = [], scalar_prefetch = 0 : i64, scratch_operands = 0 : i64, tpu.core_type = #tpu.core_type<tc>} {
    %c0 = arith.constant 0 : index
    %c0_0 = arith.constant 0 : index
    %0 = vector.load %arg0[%c0, %c0_0] : memref<4x64xf32, #tpu.memory_space<vmem>>, vector<4x64xf32>
    %c0_1 = arith.constant 0 : index
    %c0_2 = arith.constant 0 : index
    %1 = vector.load %arg1[%c0_1, %c0_2] : memref<4x64xf32, #tpu.memory_space<vmem>>, vector<4x64xf32>
    %2 = tpu.iota {dimensions = array<i32: 1>} : vector<4x64xi32>
    %c62_i32 = arith.constant 62 : i32
    %3 = vector.broadcast %c62_i32 : i32 to vector<4x64xi32>
    %4 = arith.cmpi sle, %2, %3 : vector<4x64xi32>
    %c61_i32 = arith.constant 61 : i32
    %5 = vector.broadcast %c61_i32 : i32 to vector<4x64xi32>
    %6 = arith.cmpi sle, %2, %5 : vector<4x64xi32>
    %7 = arith.extui %4 : vector<4x64xi1> to vector<4x64xi32>
    %8 = arith.sitofp %7 : vector<4x64xi32> to vector<4x64xf32>
    %9 = arith.extui %6 : vector<4x64xi1> to vector<4x64xi32>
    %10 = arith.sitofp %9 : vector<4x64xi32> to vector<4x64xf32>
    %11 = vector.shape_cast %1 : vector<4x64xf32> to vector<1x4x64xf32>
    %cst = arith.constant dense<0xFF800000> : vector<1xf32>
    %12 = vector.multi_reduction <maximumf>, %11, %cst [1, 2] : vector<1x4x64xf32> to vector<1xf32>
    %13 = vector.shape_cast %12 : vector<1xf32> to vector<1x1x1xf32>
    %14 = vector.extract %13[0, 0, 0] : f32 from vector<1x1x1xf32>
    %cst_3 = arith.constant 5.000000e+04 : f32
    %15 = arith.cmpf ogt, %14, %cst_3 : f32
    %cst_4 = arith.constant 5.000000e+04 : f32
    %16 = vector.broadcast %cst_4 : f32 to vector<4x64xf32>
    %17 = arith.cmpf ogt, %1, %16 : vector<4x64xf32>
    %cst_5 = arith.constant 4.000000e+04 : f32
    %18 = vector.broadcast %cst_5 : f32 to vector<4x64xf32>
    %19 = arith.cmpf ogt, %1, %18 : vector<4x64xf32>
    %cst_6 = arith.constant 5.000000e+04 : f32
    %20 = vector.broadcast %cst_6 : f32 to vector<4x64xf32>
    %21 = arith.cmpf ole, %1, %20 : vector<4x64xf32>
    %22 = arith.andi %19, %21 : vector<4x64xi1>
    %cst_7 = arith.constant 4.000000e+04 : f32
    %23 = vector.broadcast %cst_7 : f32 to vector<4x64xf32>
    %24 = arith.subf %1, %23 : vector<4x64xf32>
    %cst_8 = arith.constant 1.000000e+04 : f32
    %25 = vector.broadcast %cst_8 : f32 to vector<4x64xf32>
    %26 = arith.divf %24, %25 : vector<4x64xf32>
    %cst_9 = arith.constant 2.000000e-01 : f32
    %27 = vector.broadcast %cst_9 : f32 to vector<4x64xf32>
    %28 = arith.mulf %27, %26 : vector<4x64xf32>
    %cst_10 = arith.constant 1.000000e+00 : f32
    %29 = vector.broadcast %cst_10 : f32 to vector<4x64xf32>
    %30 = arith.addf %29, %28 : vector<4x64xf32>
    %cst_11 = arith.constant 1.200000e+00 : f32
    %31 = vector.broadcast %cst_11 : f32 to vector<4x64xf32>
    %32 = arith.mulf %0, %31 : vector<4x64xf32>
    %33 = arith.select %17, %32, %0 : vector<4x64xi1>, vector<4x64xf32>
    %34 = arith.mulf %0, %30 : vector<4x64xf32>
    %35 = arith.select %22, %34, %33 : vector<4x64xi1>, vector<4x64xf32>
    %36 = arith.select %15, %35, %0 : vector<4x64xf32>
    %c63_i32 = arith.constant 63 : i32
    %37 = tpu.dynamic_rotate %36 by %c63_i32 dim 1 : vector<4x64xf32>, i32 -> vector<4x64xf32>
    %c63_i32_12 = arith.constant 63 : i32
    %38 = tpu.dynamic_rotate %1 by %c63_i32_12 dim 1 : vector<4x64xf32>, i32 -> vector<4x64xf32>
    %39 = arith.subf %37, %36 : vector<4x64xf32>
    %40 = arith.subf %38, %1 : vector<4x64xf32>
    %c63_i32_13 = arith.constant 63 : i32
    %41 = tpu.dynamic_rotate %39 by %c63_i32_13 dim 1 : vector<4x64xf32>, i32 -> vector<4x64xf32>
    %42 = arith.subf %41, %39 : vector<4x64xf32>
    %43 = math.absf %39 : vector<4x64xf32>
    %44 = math.absf %40 : vector<4x64xf32>
    %cst_14 = arith.constant dense<0.000000e+00> : vector<4xf32>
    %45 = vector.multi_reduction <add>, %1, %cst_14 [1] : vector<4x64xf32> to vector<4xf32>
    %46 = vector.shape_cast %45 : vector<4xf32> to vector<4x1xf32>
    %cst_15 = arith.constant 6.400000e+01 : f32
    %47 = vector.broadcast %cst_15 : f32 to vector<4x1xf32>
    %48 = arith.divf %46, %47 : vector<4x1xf32>
    %49 = vector.broadcast %48 : vector<4x1xf32> to vector<4x64xf32>
    %50 = arith.subf %1, %49 : vector<4x64xf32>
    %51 = arith.mulf %50, %50 : vector<4x64xf32>
    %c63_i32_16 = arith.constant 63 : i32
    %52 = tpu.dynamic_rotate %50 by %c63_i32_16 dim 1 : vector<4x64xf32>, i32 -> vector<4x64xf32>
    %53 = arith.addf %50, %52 : vector<4x64xf32>
    %c62_i32_17 = arith.constant 62 : i32
    %54 = tpu.dynamic_rotate %53 by %c62_i32_17 dim 1 : vector<4x64xf32>, i32 -> vector<4x64xf32>
    %55 = arith.addf %53, %54 : vector<4x64xf32>
    %c60_i32 = arith.constant 60 : i32
    %56 = tpu.dynamic_rotate %55 by %c60_i32 dim 1 : vector<4x64xf32>, i32 -> vector<4x64xf32>
    %57 = arith.addf %55, %56 : vector<4x64xf32>
    %c56_i32 = arith.constant 56 : i32
    %58 = tpu.dynamic_rotate %57 by %c56_i32 dim 1 : vector<4x64xf32>, i32 -> vector<4x64xf32>
    %59 = arith.addf %57, %58 : vector<4x64xf32>
    %c49_i32 = arith.constant 49 : i32
    %60 = tpu.dynamic_rotate %50 by %c49_i32 dim 1 : vector<4x64xf32>, i32 -> vector<4x64xf32>
    %61 = arith.subf %59, %60 : vector<4x64xf32>
    %c63_i32_18 = arith.constant 63 : i32
    %62 = tpu.dynamic_rotate %51 by %c63_i32_18 dim 1 : vector<4x64xf32>, i32 -> vector<4x64xf32>
    %63 = arith.addf %51, %62 : vector<4x64xf32>
    %c62_i32_19 = arith.constant 62 : i32
    %64 = tpu.dynamic_rotate %63 by %c62_i32_19 dim 1 : vector<4x64xf32>, i32 -> vector<4x64xf32>
    %65 = arith.addf %63, %64 : vector<4x64xf32>
    %c60_i32_20 = arith.constant 60 : i32
    %66 = tpu.dynamic_rotate %65 by %c60_i32_20 dim 1 : vector<4x64xf32>, i32 -> vector<4x64xf32>
    %67 = arith.addf %65, %66 : vector<4x64xf32>
    %c56_i32_21 = arith.constant 56 : i32
    %68 = tpu.dynamic_rotate %67 by %c56_i32_21 dim 1 : vector<4x64xf32>, i32 -> vector<4x64xf32>
    %69 = arith.addf %67, %68 : vector<4x64xf32>
    %c49_i32_22 = arith.constant 49 : i32
    %70 = tpu.dynamic_rotate %51 by %c49_i32_22 dim 1 : vector<4x64xf32>, i32 -> vector<4x64xf32>
    %71 = arith.subf %69, %70 : vector<4x64xf32>
    %72 = arith.mulf %61, %61 : vector<4x64xf32>
    %cst_23 = arith.constant 0.0666666701 : f32
    %73 = vector.broadcast %cst_23 : f32 to vector<4x64xf32>
    %74 = arith.mulf %72, %73 : vector<4x64xf32>
    %75 = arith.subf %71, %74 : vector<4x64xf32>
    %cst_24 = arith.constant 0.0714285746 : f32
    %76 = vector.broadcast %cst_24 : f32 to vector<4x64xf32>
    %77 = arith.mulf %75, %76 : vector<4x64xf32>
    %cst_25 = arith.constant 0.000000e+00 : f32
    %78 = vector.broadcast %cst_25 : f32 to vector<4x64xf32>
    %79 = arith.maximumf %77, %78 : vector<4x64xf32>
    %c7_i32 = arith.constant 7 : i32
    %80 = tpu.dynamic_rotate %79 by %c7_i32 dim 1 : vector<4x64xf32>, i32 -> vector<4x64xf32>
    %81 = vector.extract_strided_slice %79 {offsets = [0, 0], sizes = [4, 1], strides = [1, 1]} : vector<4x64xf32> to vector<4x1xf32>
    %82 = vector.extract_strided_slice %79 {offsets = [0, 49], sizes = [4, 1], strides = [1, 1]} : vector<4x64xf32> to vector<4x1xf32>
    %c7_i32_26 = arith.constant 7 : i32
    %83 = vector.broadcast %c7_i32_26 : i32 to vector<4x64xi32>
    %84 = arith.cmpi slt, %2, %83 : vector<4x64xi32>
    %c56_i32_27 = arith.constant 56 : i32
    %85 = vector.broadcast %c56_i32_27 : i32 to vector<4x64xi32>
    %86 = arith.cmpi sgt, %2, %85 : vector<4x64xi32>
    %87 = vector.shape_cast %82 : vector<4x1xf32> to vector<4x1xf32>
    %88 = vector.broadcast %87 : vector<4x1xf32> to vector<4x64xf32>
    %89 = arith.select %86, %88, %80 : vector<4x64xi1>, vector<4x64xf32>
    %90 = vector.shape_cast %81 : vector<4x1xf32> to vector<4x1xf32>
    %91 = vector.broadcast %90 : vector<4x1xf32> to vector<4x64xf32>
    %92 = arith.select %84, %91, %89 : vector<4x64xi1>, vector<4x64xf32>
    %cst_28 = arith.constant dense<0xFF800000> : vector<4xf32>
    %93 = vector.multi_reduction <maximumf>, %92, %cst_28 [1] : vector<4x64xf32> to vector<4xf32>
    %94 = vector.shape_cast %93 : vector<4xf32> to vector<4x1xf32>
    %cst_29 = arith.constant 9.99999993E-9 : f32
    %95 = vector.broadcast %cst_29 : f32 to vector<4x1xf32>
    %96 = arith.addf %94, %95 : vector<4x1xf32>
    %cst_30 = arith.constant 5.000000e-02 : f32
    %97 = vector.broadcast %cst_30 : f32 to vector<4x1xf32>
    %98 = arith.mulf %97, %96 : vector<4x1xf32>
    %99 = vector.broadcast %98 : vector<4x1xf32> to vector<4x64xf32>
    %100 = arith.cmpf olt, %92, %99 : vector<4x64xf32>
    %101 = arith.extui %100 : vector<4x64xi1> to vector<4x64xi32>
    %102 = arith.sitofp %101 : vector<4x64xi32> to vector<4x64xf32>
    %c63_i32_31 = arith.constant 63 : i32
    %103 = tpu.dynamic_rotate %102 by %c63_i32_31 dim 1 : vector<4x64xf32>, i32 -> vector<4x64xf32>
    %cst_32 = arith.constant 1.000000e+00 : f32
    %104 = vector.broadcast %cst_32 : f32 to vector<4x8x64xf32>
    %105 = math.absf %42 : vector<4x64xf32>
    %cst_33 = arith.constant 0x7F800000 : f32
    %106 = vector.broadcast %cst_33 : f32 to vector<4x64xf32>
    %107 = arith.select %6, %105, %106 : vector<4x64xi1>, vector<4x64xf32>
    %108 = vector.shape_cast %107 : vector<4x64xf32> to vector<4x64x1xf32>
    %109 = vector.shape_cast %107 : vector<4x64xf32> to vector<4x1x64xf32>
    %110 = vector.broadcast %108 : vector<4x64x1xf32> to vector<4x64x64xf32>
    %111 = vector.broadcast %109 : vector<4x1x64xf32> to vector<4x64x64xf32>
    %112 = arith.cmpf ole, %110, %111 : vector<4x64x64xf32>
    %113 = arith.extui %112 : vector<4x64x64xi1> to vector<4x64x64xi32>
    %114 = arith.sitofp %113 : vector<4x64x64xi32> to vector<4x64x64xf32>
    "tpu.trace_start"() <{level = 10 : i32, message = "bmj,bji->bmi"}> : () -> ()
    %cst_34 = arith.constant dense<0.000000e+00> : vector<4x8x64xf32>
    %115 = tpu.matmul %104, %114, %cst_34 {dimension_numbers = #tpu.dot_dimension_numbers<[2], [1], [1], [2], [0, 0, 0, 1, 1, 2], [0], [0]>} : vector<4x8x64xf32>, vector<4x64x64xf32>, vector<4x8x64xf32> -> vector<4x8x64xf32>
    %cst_35 = arith.constant 3.100000e+01 : f32
    "tpu.trace_stop"() : () -> ()
    %116 = vector.broadcast %cst_35 : f32 to vector<4x8x64xf32>
    %117 = arith.cmpf oge, %115, %116 : vector<4x8x64xf32>
    %118 = vector.shape_cast %107 : vector<4x64xf32> to vector<4x1x64xf32>
    %cst_36 = arith.constant 0x7F800000 : f32
    %119 = vector.shape_cast %118 : vector<4x1x64xf32> to vector<4x1x64xf32>
    %120 = vector.broadcast %119 : vector<4x1x64xf32> to vector<4x8x64xf32>
    %121 = vector.broadcast %cst_36 : f32 to vector<4x8x64xf32>
    %122 = arith.select %117, %120, %121 : vector<4x8x64xi1>, vector<4x8x64xf32>
    %cst_37 = arith.constant dense<0x7F800000> : vector<4x8xf32>
    %123 = vector.multi_reduction <minimumf>, %122, %cst_37 [2] : vector<4x8x64xf32> to vector<4x8xf32>
    %cst_38 = arith.constant dense<0x7F800000> : vector<4xf32>
    %124 = vector.multi_reduction <minimumf>, %123, %cst_38 [1] : vector<4x8xf32> to vector<4xf32>
    %125 = vector.shape_cast %124 : vector<4xf32> to vector<4x1xf32>
    %126 = vector.broadcast %125 : vector<4x1xf32> to vector<4x64xf32>
    %127 = arith.subf %42, %126 : vector<4x64xf32>
    %128 = math.absf %127 : vector<4x64xf32>
    %cst_39 = arith.constant 0x7F800000 : f32
    %129 = vector.broadcast %cst_39 : f32 to vector<4x64xf32>
    %130 = arith.select %6, %128, %129 : vector<4x64xi1>, vector<4x64xf32>
    %131 = vector.shape_cast %130 : vector<4x64xf32> to vector<4x64x1xf32>
    %132 = vector.shape_cast %130 : vector<4x64xf32> to vector<4x1x64xf32>
    %133 = vector.broadcast %131 : vector<4x64x1xf32> to vector<4x64x64xf32>
    %134 = vector.broadcast %132 : vector<4x1x64xf32> to vector<4x64x64xf32>
    %135 = arith.cmpf ole, %133, %134 : vector<4x64x64xf32>
    %136 = arith.extui %135 : vector<4x64x64xi1> to vector<4x64x64xi32>
    %137 = arith.sitofp %136 : vector<4x64x64xi32> to vector<4x64x64xf32>
    "tpu.trace_start"() <{level = 10 : i32, message = "bmj,bji->bmi"}> : () -> ()
    %cst_40 = arith.constant dense<0.000000e+00> : vector<4x8x64xf32>
    %138 = tpu.matmul %104, %137, %cst_40 {dimension_numbers = #tpu.dot_dimension_numbers<[2], [1], [1], [2], [0, 0, 0, 1, 1, 2], [0], [0]>} : vector<4x8x64xf32>, vector<4x64x64xf32>, vector<4x8x64xf32> -> vector<4x8x64xf32>
    %cst_41 = arith.constant 3.100000e+01 : f32
    "tpu.trace_stop"() : () -> ()
    %139 = vector.broadcast %cst_41 : f32 to vector<4x8x64xf32>
    %140 = arith.cmpf oge, %138, %139 : vector<4x8x64xf32>
    %141 = vector.shape_cast %130 : vector<4x64xf32> to vector<4x1x64xf32>
    %cst_42 = arith.constant 0x7F800000 : f32
    %142 = vector.shape_cast %141 : vector<4x1x64xf32> to vector<4x1x64xf32>
    %143 = vector.broadcast %142 : vector<4x1x64xf32> to vector<4x8x64xf32>
    %144 = vector.broadcast %cst_42 : f32 to vector<4x8x64xf32>
    %145 = arith.select %140, %143, %144 : vector<4x8x64xi1>, vector<4x8x64xf32>
    %cst_43 = arith.constant dense<0x7F800000> : vector<4x8xf32>
    %146 = vector.multi_reduction <minimumf>, %145, %cst_43 [2] : vector<4x8x64xf32> to vector<4x8xf32>
    %cst_44 = arith.constant dense<0x7F800000> : vector<4xf32>
    %147 = vector.multi_reduction <minimumf>, %146, %cst_44 [1] : vector<4x8xf32> to vector<4xf32>
    %148 = vector.shape_cast %147 : vector<4xf32> to vector<4x1xf32>
    %cst_45 = arith.constant 2.500000e+00 : f32
    %149 = vector.broadcast %cst_45 : f32 to vector<4x1xf32>
    %150 = arith.mulf %149, %148 : vector<4x1xf32>
    %151 = arith.addf %125, %150 : vector<4x1xf32>
    %152 = math.absf %42 : vector<4x64xf32>
    %153 = vector.broadcast %151 : vector<4x1xf32> to vector<4x64xf32>
    %154 = arith.cmpf ogt, %152, %153 : vector<4x64xf32>
    %155 = arith.extui %154 : vector<4x64xi1> to vector<4x64xi32>
    %156 = arith.sitofp %155 : vector<4x64xi32> to vector<4x64xf32>
    %cst_46 = arith.constant 0.000000e+00 : f32
    %157 = vector.broadcast %cst_46 : f32 to vector<4x64xf32>
    %158 = arith.select %6, %156, %157 : vector<4x64xi1>, vector<4x64xf32>
    %c1_i32 = arith.constant 1 : i32
    %159 = tpu.dynamic_rotate %158 by %c1_i32 dim 1 : vector<4x64xf32>, i32 -> vector<4x64xf32>
    %160 = arith.addf %158, %159 : vector<4x64xf32>
    %c63_i32_47 = arith.constant 63 : i32
    %161 = tpu.dynamic_rotate %158 by %c63_i32_47 dim 1 : vector<4x64xf32>, i32 -> vector<4x64xf32>
    %162 = arith.addf %160, %161 : vector<4x64xf32>
    %cst_48 = arith.constant 0.000000e+00 : f32
    %163 = vector.broadcast %cst_48 : f32 to vector<4x64xf32>
    %164 = arith.cmpf ogt, %162, %163 : vector<4x64xf32>
    %165 = arith.extui %164 : vector<4x64xi1> to vector<4x64xi32>
    %166 = arith.sitofp %165 : vector<4x64xi32> to vector<4x64xf32>
    %cst_49 = arith.constant 0.000000e+00 : f32
    %167 = vector.broadcast %cst_49 : f32 to vector<4x64xf32>
    %168 = arith.select %6, %166, %167 : vector<4x64xi1>, vector<4x64xf32>
    %cst_50 = arith.constant 1.200000e-01 : f32
    %169 = vector.broadcast %cst_50 : f32 to vector<4x64xf32>
    %170 = arith.maximumf %44, %169 : vector<4x64xf32>
    %171 = arith.mulf %43, %103 : vector<4x64xf32>
    %cst_51 = arith.constant 1.000000e+00 : f32
    %172 = vector.broadcast %cst_51 : f32 to vector<4x64xf32>
    %173 = arith.subf %172, %103 : vector<4x64xf32>
    %174 = arith.mulf %43, %173 : vector<4x64xf32>
    %cst_52 = arith.constant 1.500000e+00 : f32
    %175 = vector.broadcast %cst_52 : f32 to vector<4x64xf32>
    %176 = arith.mulf %175, %170 : vector<4x64xf32>
    %177 = arith.subf %174, %176 : vector<4x64xf32>
    %cst_53 = arith.constant 0.000000e+00 : f32
    %178 = vector.broadcast %cst_53 : f32 to vector<4x64xf32>
    %179 = arith.maximumf %177, %178 : vector<4x64xf32>
    %180 = arith.subf %36, %1 : vector<4x64xf32>
    %181 = arith.mulf %180, %180 : vector<4x64xf32>
    %cst_54 = arith.constant 3.906250e-03 : f32
    %182 = vector.broadcast %cst_54 : f32 to vector<4x64xf32>
    %183 = arith.mulf %181, %182 : vector<4x64xf32>
    %184 = arith.subf %43, %44 : vector<4x64xf32>
    %185 = arith.mulf %184, %184 : vector<4x64xf32>
    %cst_55 = arith.constant 0.00119047624 : f32
    %186 = vector.broadcast %cst_55 : f32 to vector<4x64xf32>
    %187 = arith.mulf %185, %186 : vector<4x64xf32>
    %188 = arith.mulf %171, %171 : vector<4x64xf32>
    %cst_56 = arith.constant 0.00297619053 : f32
    %189 = vector.broadcast %cst_56 : f32 to vector<4x64xf32>
    %190 = arith.mulf %188, %189 : vector<4x64xf32>
    %191 = arith.addf %187, %190 : vector<4x64xf32>
    %192 = arith.mulf %179, %179 : vector<4x64xf32>
    %cst_57 = arith.constant 3.96825402E-4 : f32
    %193 = vector.broadcast %cst_57 : f32 to vector<4x64xf32>
    %194 = arith.mulf %192, %193 : vector<4x64xf32>
    %195 = arith.addf %191, %194 : vector<4x64xf32>
    %196 = arith.mulf %8, %195 : vector<4x64xf32>
    %197 = arith.addf %183, %196 : vector<4x64xf32>
    %198 = arith.mulf %42, %42 : vector<4x64xf32>
    %199 = arith.mulf %10, %198 : vector<4x64xf32>
    %cst_58 = arith.constant 3.22580658E-4 : f32
    %200 = vector.broadcast %cst_58 : f32 to vector<4x64xf32>
    %201 = arith.mulf %199, %200 : vector<4x64xf32>
    %202 = arith.addf %197, %201 : vector<4x64xf32>
    %203 = vector.shape_cast %202 : vector<4x64xf32> to vector<1x4x64xf32>
    %cst_59 = arith.constant dense<0.000000e+00> : vector<1xf32>
    %204 = vector.multi_reduction <add>, %203, %cst_59 [1, 2] : vector<1x4x64xf32> to vector<1xf32>
    %205 = vector.shape_cast %204 : vector<1xf32> to vector<1x1x1xf32>
    %206 = vector.extract %205[0, 0, 0] : f32 from vector<1x1x1xf32>
    %207 = arith.subf %37, %38 : vector<4x64xf32>
    %208 = arith.mulf %207, %207 : vector<4x64xf32>
    %cst_60 = arith.constant 1.000000e+00 : f32
    %209 = vector.broadcast %cst_60 : f32 to vector<4x64xf32>
    %210 = arith.subf %209, %103 : vector<4x64xf32>
    %211 = arith.mulf %8, %210 : vector<4x64xf32>
    %212 = vector.shape_cast %168 : vector<4x64xf32> to vector<1x4x64xf32>
    %cst_61 = arith.constant dense<0.000000e+00> : vector<1xf32>
    %213 = vector.multi_reduction <add>, %212, %cst_61 [1, 2] : vector<1x4x64xf32> to vector<1xf32>
    %214 = vector.shape_cast %213 : vector<1xf32> to vector<1x1x1xf32>
    %215 = vector.extract %214[0, 0, 0] : f32 from vector<1x1x1xf32>
    %216 = arith.mulf %208, %168 : vector<4x64xf32>
    %217 = vector.shape_cast %216 : vector<4x64xf32> to vector<1x4x64xf32>
    %cst_62 = arith.constant dense<0.000000e+00> : vector<1xf32>
    %218 = vector.multi_reduction <add>, %217, %cst_62 [1, 2] : vector<1x4x64xf32> to vector<1xf32>
    %219 = vector.shape_cast %218 : vector<1xf32> to vector<1x1x1xf32>
    %220 = vector.extract %219[0, 0, 0] : f32 from vector<1x1x1xf32>
    %221 = vector.shape_cast %211 : vector<4x64xf32> to vector<1x4x64xf32>
    %cst_63 = arith.constant dense<0.000000e+00> : vector<1xf32>
    %222 = vector.multi_reduction <add>, %221, %cst_63 [1, 2] : vector<1x4x64xf32> to vector<1xf32>
    %223 = vector.shape_cast %222 : vector<1xf32> to vector<1x1x1xf32>
    %224 = vector.extract %223[0, 0, 0] : f32 from vector<1x1x1xf32>
    %225 = arith.mulf %208, %211 : vector<4x64xf32>
    %226 = vector.shape_cast %225 : vector<4x64xf32> to vector<1x4x64xf32>
    %cst_64 = arith.constant dense<0.000000e+00> : vector<1xf32>
    %227 = vector.multi_reduction <add>, %226, %cst_64 [1, 2] : vector<1x4x64xf32> to vector<1xf32>
    %228 = vector.shape_cast %227 : vector<1xf32> to vector<1x1x1xf32>
    %229 = vector.extract %228[0, 0, 0] : f32 from vector<1x1x1xf32>
    %cst_65 = arith.constant 0.000000e+00 : f32
    %230 = arith.cmpf ogt, %215, %cst_65 : f32
    %cst_66 = arith.constant 1.000000e+00 : f32
    %231 = arith.maximumf %215, %cst_66 : f32
    %232 = arith.divf %220, %231 : f32
    %cst_67 = arith.constant 4.000000e+00 : f32
    %233 = arith.mulf %232, %cst_67 : f32
    %cst_68 = arith.constant 0.000000e+00 : f32
    %234 = arith.select %230, %233, %cst_68 : f32
    %cst_69 = arith.constant 0.000000e+00 : f32
    %235 = arith.cmpf ogt, %224, %cst_69 : f32
    %cst_70 = arith.constant 1.000000e+00 : f32
    %236 = arith.maximumf %224, %cst_70 : f32
    %237 = arith.divf %229, %236 : f32
    %cst_71 = arith.constant 5.000000e-01 : f32
    %238 = arith.mulf %237, %cst_71 : f32
    %cst_72 = arith.constant 0.000000e+00 : f32
    %239 = arith.select %235, %238, %cst_72 : f32
    %240 = arith.addf %206, %234 : f32
    %241 = arith.addf %240, %239 : f32
    %242 = vector.broadcast %241 : f32 to vector<1x1xf32>
    %c0_73 = arith.constant 0 : index
    %c0_74 = arith.constant 0 : index
    %243 = vector.load %arg2[%c0_73, %c0_74] : memref<1x1xf32, #tpu.memory_space<vmem>>, vector<1x1xf32>
    tpu.vector_store %arg2[%c0_73, %c0_74], %242 {strides = array<i32>} : memref<1x1xf32, #tpu.memory_space<vmem>>, vector<1x1xf32>,
    return
  }
}

</mosaic_0001>

<bundles_post_ra>
// kernel: adaptive_window_loss.1
= control target key start
LH: loop header
LB: loop body
LE: loop exit
PB: predicated region body
PF: predicated region fallthrough
CT: control target
= control target key end

     0   :  { %7 = vsyncpa [#allocation3], 0  ;;  %s2760_s0 = inlined_call_operand.hbm [shape: f32[4,64], index: 0, kind: input, shape index: {}]   ;;  %s2761_s1 = inlined_call_operand.hbm [shape: f32[4,64], index: 1, kind: input, shape index: {}]   ;;  %s2762_s2 = inlined_call_operand.hbm [shape: f32[1,1], index: 2, kind: output, shape index: {}]  }
   0x1   :  { %8 = vsyncpa [#allocation6], 0 }
   0x2   :  { %9 = vsyncpa [#allocation4], 0  ;;  %s2246_s9 = smov [#allocation2]   ;;  %s2247_s11 = smov [#allocation5]  }
   0x3   :  { %s16_s10 = sshll.u32 %s2246_s9, 4  ;;  %s26_s12 = sshll.u32 %s2247_s11, 4  ;;  %s17_s10 = int_to_ptr.vmem [resolvable:$true] %s16_s10  ;;  %s27_s12 = int_to_ptr.vmem [resolvable:$true] %s26_s12 }
   0x4   :  { %s2174_s15 = scalar_lea.hbm %s2760_s0, 64 }
   0x5   :  { %p2175_p0 = scmp.ne.s32.totalorder %s2760_s0, %s2174_s15  ;;  %p2178_p1 = scmp.lt.u32.totalorder %s2174_s15, %s2760_s0 }
   0x7   :  { %p2180_p2 = pnand %p2178_p1, %p2175_p0 }
   0x9   :  { %2183 = shalt.err (!%p2180_p2)
}
   0xa   :  { %s2184_s20 = scalar_lea.vmem %s17_s10, 64  ;;  %p2189_p4 = scmp.lt.s32.totalorder %s17_s10, %s17_s10 }
   0xb   :  { %p2185_p3 = scmp.ne.s32.totalorder %s17_s10, %s2184_s20  ;;  %p2190_p5 = scmp.lt.s32.totalorder %s2184_s20, %s2184_s20 }
   0xd   :  { %p2191_p6 = por %p2190_p5, %p2189_p4 }
   0xf   :  { %p2192_p7 = pnand %p2191_p6, %p2185_p3 }
  0x11   :  { %2195 = shalt.err (!%p2192_p7)
}
  0x12   :  { %19 = dma.hbm_to_vmem [thread:$0]  %s2760_s0, 64, %s17_s10, [#allocation3]  }
  0x13   :  { %s2196_s25 = scalar_lea.hbm %s2761_s1, 64 }
  0x14   :  { %p2197_p8 = scmp.ne.s32.totalorder %s2761_s1, %s2196_s25  ;;  %p2200_p9 = scmp.lt.u32.totalorder %s2196_s25, %s2761_s1 }
  0x16   :  { %p2202_p10 = pnand %p2200_p9, %p2197_p8 }
  0x18   :  { %2205 = shalt.err (!%p2202_p10)
}
  0x19   :  { %s2206_s30 = scalar_lea.vmem %s27_s12, 64  ;;  %p2211_p12 = scmp.lt.s32.totalorder %s27_s12, %s27_s12 }
  0x1a   :  { %p2207_p11 = scmp.ne.s32.totalorder %s27_s12, %s2206_s30  ;;  %p2212_p13 = scmp.lt.s32.totalorder %s2206_s30, %s2206_s30 }
  0x1c   :  { %p2213_p0 = por %p2212_p13, %p2211_p12 }
  0x1e   :  { %p2214_p1 = pnand %p2213_p0, %p2207_p11 }
  0x20   :  { %2217 = shalt.err (!%p2214_p1)
}
  0x21   :  { %29 = dma.hbm_to_vmem [thread:$0]  %s2761_s1, 64, %s27_s12, [#allocation6]  }
  0x22   :  { %2240 = dma.done.wait [#allocation3], 64  }
  0x23   :  { %2241 = vsyncadd [#allocation3], 4294967232 }
  0x24   :  { %2242 = dma.done.wait [#allocation6], 64  }
  0x25   :  { %2243 = vsyncadd [#allocation6], 4294967232  ;;  %vm46_vm0 = vcmask 519168   ;;  %v2306_v0 = vld [vmem:[#allocation5] sm:$0xf]  ;;  %s2248_s5 = smov 64   ;;  %v38_v33 = vlaneseq }
  0x26   :  { %v47_v1 = vsel %vm46_vm0, %v2306_v0, -inf  ;;  %v1669_v9 = vadd.f32 -40000.0, %v2306_v0  ;;  %v36_v12 = vld [vmem:[#allocation2] sm:$0xf]  ;;  %vm58_vm1 = vcmp.gt.f32.partialorder %v2306_v0, 50000.0  ;;  %vm59_vm2 = vcmp.gt.f32.partialorder %v2306_v0, 40000.0 }
  0x27   :  { %48 = vmax.xlane.f32.xlu0 %v47_v1  ;;  %v67_v14 = vmul.f32 1.2, %v36_v12  ;;  %vm60_vm3 = vcmp.le.f32.partialorder %v2306_v0, 50000.0  ;;  %vm75_vm6 = vcmask 1048064   ;;  %s2249_s6 = smov 1   ;;  %s2250_s7 = smov 127  }
  0x28   :  { %v64_v10 = vmul.f32 0.0001, %v1669_v9  ;;  %vm61_vm4 = vmand %vm59_vm2, %vm60_vm3  ;;  %v2251_v34 = vmov 0.0|0.0   ;;  %v2345_v35 = vand.u32 127, %v38_v33  ;;  %v2347_v36 = vshrl.u32 %v38_v33, 7  ;;  %s2257_s8 = smov 126  }
  0x29   :  { %v68_v16 = vsel %vm58_vm1, %v67_v14, %v36_v12  ;;  %2033 = vmatprep.subr.bf16.mxu0 %v2251_v34  ;;  %2045 = vmatprep.subr.bf16.mxu1 %v2251_v34  ;;  %vm2252_vm8 = vmmov 0   ;;  %v2253_v43 = vmov 0.0   ;;  %v2254_v48 = vmov 1966171168   ;;  %s2258_s9 = smov 124   ;;  %s2259_s10 = smov 113  }
  0x2a   :  { %v65_v11 = vmul.f32 0.2, %v64_v10  ;;  %vm2763_vm7 = vcmp.le.s32.totalorder %v2345_v35, 61  ;;  %v2351_v37 = vsub.s32 0, %v2347_v36  ;;  %v299_v40 = vsub.s32 1, %v2347_v36  ;;  %1897 = vmatprep.mubr.msk.f32.mxu0 %vm2252_vm8, %v2253_v43  ;;  %1916 = vmatprep.mubr.msk.f32.mxu1 %vm2252_vm8, %v2253_v43  ;;  %s2260_s11 = smov 120  }
  0x2b   :  { %v334_v44 = vsub.s32 2, %v2347_v36  ;;  %v369_v45 = vsub.s32 3, %v2347_v36  ;;  %v404_v49 = vunpack.c.l.s4 %v2254_v48  ;;  %v111_v50 = vsel %vm46_vm0, %v2306_v0, 0.0  ;;  %s2263_s12 = smov 71   ;;  %s2264_s13 = smov 65  }
  0x2c   :  { %v66_v13 = vadd.f32 1.0, %v65_v11  ;;  %v2255_v61 = vmov 1.0|1.0   ;;  %v2256_v14 = vmov 1.0   ;;  %s2265_s18 = smov 1.0   ;;  %s2266_s29 = smov [#allocation7]  }
  0x2d   :  { %v405_v51 = vunpack.c.0.s8 %v404_v49  ;;  %s1657_s30 = sshll.u32 %s2266_s29, 4  ;;  %s1658_s30 = int_to_ptr.vmem [resolvable:$true] %s1657_s30 }
  0x2e   :  { %v69_v15 = vmul.f32 %v66_v13, %v36_v12  ;;  %s2218_s3 = scalar_lea.vmem %s1658_s30, 16  ;;  %p2223_p6 = scmp.lt.s32.totalorder %s1658_s30, %s1658_s30 }
  0x2f   :  { %v2372_v52 = vsub.s32 %v405_v51, %v2347_v36  ;;  %p2219_p5 = scmp.ne.s32.totalorder %s1658_s30, %s2218_s3 }
  0x30   :  { %v70_v17 = vsel %vm61_vm4, %v69_v15, %v68_v16 }
  0xb4   :  { %v49_v2 = vpop.xlane.xlu0 %48 }
  0xb5   :  { %v50_v3 = vrot.slane %v49_v2, 4 }
  0xb7   :  { %v51_v4 = vmax.f32 %v49_v2, %v50_v3 }
  0xb9   :  { %v52_v5 = vrot.slane %v51_v4, 2 }
  0xbb   :  { %v53_v6 = vmax.f32 %v51_v4, %v52_v5 }
  0xbd   :  { %v54_v7 = vrot.slane %v53_v6, 1 }
  0xbf   :  { %v55_v8 = vmax.f32 %v53_v6, %v54_v7 }
  0xc1   :  { %2129 = vpush %v55_v8 }
  0xf2   :  { %s2130_s1 = spop %2129 }
  0xf3   :  { %p57_p2 = scmp.gt.f32.partialorder %s2130_s1, 50000.0  ;;  %s2222_s1 = scalar_lea.vmem %s1658_s30, 32 }
  0xf4   :  { %p2224_p7 = scmp.lt.s32.totalorder %s2222_s1, %s2218_s3 }
  0xf5   :  { %s71_s4 = scalar_select %p57_p2, 1, 0 }
  0xf6   :  { %p2225_p8 = por %p2224_p7, %p2223_p6 }
  0xf7   :  { %v72_v18 = vstv %s71_s4 }
  0xf8   :  { %vm73_vm5 = vcmp.eq.s32.totalorder %v72_v18, 1  ;;  %p2226_p9 = pnand %p2225_p8, %p2219_p5 }
  0xf9   :  { %v2314_v19 = vsel %vm73_vm5, %v70_v17, %v36_v12 }
  0xfa   :  { %76 = vrot.lane.b32.xlu0 %v2314_v19, %s2248_s5 }
 0x16c   :  { %v77_v20 = vpop.permute.xlu0 %76 }
 0x16d   :  { %v78_v21 = vsel %vm75_vm6, %v77_v20, %v2314_v19 }
 0x16e   :  { %79 = vrot.lane.b32.xlu1 %v78_v21, %s2248_s5 }
 0x172   :  { %89 = vrot.lane.b32.xlu1 %v2314_v19, %s2249_s6 }
 0x1e0   :  { %v80_v22 = vpop.permute.xlu1 %79 }
 0x1e1   :  { %v2325_v23 = vsel %vm75_vm6, %v80_v22, %v2314_v19 }
 0x1e4   :  { %v90_v24 = vpop.permute.xlu1 %89 }
 0x1e5   :  { %v2328_v25 = vsub.f32 %v2325_v23, %v90_v24 }
 0x1e7   :  { %99 = vrot.lane.b32.xlu1 %v2328_v25, %s2250_s7 }
 0x259   :  { %v100_v26 = vpop.permute.xlu1 %99 }
 0x25a   :  { %102 = vrot.lane.b32.xlu1 %v100_v26, %s2248_s5 }
 0x2cc   :  { %v103_v27 = vpop.permute.xlu1 %102 }
 0x2cd   :  { %v104_v28 = vsel %vm75_vm6, %v103_v27, %v100_v26 }
 0x2ce   :  { %105 = vrot.lane.b32.xlu1 %v104_v28, %s2248_s5 }
 0x340   :  { %v106_v29 = vpop.permute.xlu1 %105 }
 0x341   :  { %v107_v30 = vsel %vm75_vm6, %v106_v29, %v100_v26 }
 0x342   :  { %v2337_v31 = vsub.f32 %v107_v30, %v2328_v25 }
 0x344   :  { %v256_v32 = vand.u32 2147483647, %v2337_v31 }
 0x346   :  { %258 = vrot.lane.b32.xlu1 %v256_v32, %s2250_s7 }
 0x3b8   :  { %v259_v38 = vpop.permute.xlu1 %258 }
 0x3b9   :  { %v261_v39 = vsel %vm2763_vm7, %v259_v38, inf }
 0x3ba   :  { %v265_v41 = vrot.slane %v261_v39, %v2351_v37  ;;  %v300_v42 = vrot.slane %v261_v39, %v299_v40  ;;  %v335_v46 = vrot.slane %v261_v39, %v334_v44  ;;  %v370_v47 = vrot.slane %v261_v39, %v369_v45 }
 0x3bb   :  { %v409_v53 = vrot.slane %v261_v39, %v2372_v52 }
 0x3bc   :  { %271 = vbcast.lane.b32.xlu0 %v265_v41, 264  ;;  %267 = vbcast.lane.b32.xlu1 %v265_v41, 256 }
 0x3bd   :  { %v410_v54 = vcombine.high %v409_v53, %v409_v53  ;;  %v2376_v55 = vrot.slane %v409_v53, %v2372_v52 }
 0x3bf   :  { %v2379_v56 = vrot.slane %v410_v54, %v2372_v52  ;;  %v2383_v57 = vrot.slane %v2376_v55, %v2351_v37  ;;  %v425_v11 = vcombine.high %v2376_v55, %v2376_v55 }
 0x3c0   :  { %306 = vbcast.lane.b32.xlu0 %v300_v42, 264  ;;  %302 = vbcast.lane.b32.xlu1 %v300_v42, 256 }
 0x3c1   :  { %v2389_v60 = vrot.slane %v2379_v56, %v2351_v37  ;;  %v426_v15 = vcombine.high %v2379_v56, %v2379_v56  ;;  %v2426_v16 = vrot.slane %v425_v11, %v2351_v37 }
 0x3c3   :  { %v2437_v20 = vrot.slane %v426_v15, %v2351_v37 }
 0x3c4   :  { %279 = vbcast.lane.b32.xlu0 %v265_v41, 280  ;;  %275 = vbcast.lane.b32.xlu1 %v265_v41, 272 }
 0x3c8   :  { %314 = vbcast.lane.b32.xlu0 %v300_v42, 280  ;;  %310 = vbcast.lane.b32.xlu1 %v300_v42, 272 }
 0x3cc   :  { %287 = vbcast.lane.b32.xlu0 %v265_v41, 296  ;;  %283 = vbcast.lane.b32.xlu1 %v265_v41, 288 }
 0x3d0   :  { %322 = vbcast.lane.b32.xlu0 %v300_v42, 296  ;;  %318 = vbcast.lane.b32.xlu1 %v300_v42, 288 }
 0x3d4   :  { %295 = vbcast.lane.b32.xlu0 %v265_v41, 312  ;;  %291 = vbcast.lane.b32.xlu1 %v265_v41, 304 }
 0x3d8   :  { %330 = vbcast.lane.b32.xlu0 %v300_v42, 312  ;;  %326 = vbcast.lane.b32.xlu1 %v300_v42, 304 }
 0x3dc   :  { %341 = vbcast.lane.b32.xlu0 %v335_v46, 264  ;;  %337 = vbcast.lane.b32.xlu1 %v335_v46, 256 }
 0x3e0   :  { %376 = vbcast.lane.b32.xlu0 %v370_v47, 264  ;;  %372 = vbcast.lane.b32.xlu1 %v370_v47, 256 }
 0x3e4   :  { %349 = vbcast.lane.b32.xlu0 %v335_v46, 280  ;;  %345 = vbcast.lane.b32.xlu1 %v335_v46, 272 }
 0x3e8   :  { %384 = vbcast.lane.b32.xlu0 %v370_v47, 280  ;;  %380 = vbcast.lane.b32.xlu1 %v370_v47, 272 }
 0x3ec   :  { %357 = vbcast.lane.b32.xlu0 %v335_v46, 296  ;;  %353 = vbcast.lane.b32.xlu1 %v335_v46, 288 }
 0x3f0   :  { %392 = vbcast.lane.b32.xlu0 %v370_v47, 296  ;;  %388 = vbcast.lane.b32.xlu1 %v370_v47, 288 }
 0x3f4   :  { %365 = vbcast.lane.b32.xlu0 %v335_v46, 312  ;;  %361 = vbcast.lane.b32.xlu1 %v335_v46, 304 }
 0x3f8   :  { %400 = vbcast.lane.b32.xlu0 %v370_v47, 312  ;;  %396 = vbcast.lane.b32.xlu1 %v370_v47, 304 }
 0x41c   :  { %112 = vadd.xlane.f32.xlu1 %v111_v50 }
 0x42e   :  { %v272_v58 = vpop.permute.xlu0 %271  ;;  %v268_v59 = vpop.permute.xlu1 %267 }
 0x42f   :  { %vm448_vm9 = vcmp.le.f32.partialorder %v272_v58, %v2383_v57  ;;  %vm447_vm10 = vcmp.le.f32.partialorder %v268_v59, %v2383_v57 }
 0x430   :  { %vm2034_vm11 = vmpackc.low %vm448_vm9, %vm447_vm10 }
 0x431   :  { %2035 = vmatpush3.bf16.msk.msra.mxu0 %vm2034_vm11, %v2255_v61 }
 0x432   :  { %v307_v62 = vpop.permute.xlu0 %306  ;;  %v303_v63 = vpop.permute.xlu1 %302  ;;  %2036 = vmatprep.subr.bf16.mxu0 %v2251_v34 }
 0x433   :  { %vm456_vm12 = vcmp.le.f32.partialorder %v307_v62, %v2389_v60  ;;  %vm455_vm13 = vcmp.le.f32.partialorder %v303_v63, %v2389_v60 }
 0x434   :  { %vm2046_vm14 = vmpackc.low %vm456_vm12, %vm455_vm13 }
 0x435   :  { %2047 = vmatpush3.bf16.msk.msra.mxu1 %vm2046_vm14, %v2255_v61 }
 0x436   :  { %v280_v1 = vpop.permute.xlu0 %279  ;;  %v276_v2 = vpop.permute.xlu1 %275  ;;  %2048 = vmatprep.subr.bf16.mxu1 %v2251_v34 }
 0x437   :  { %vm450_vm15 = vcmp.le.f32.partialorder %v280_v1, %v2383_v57  ;;  %vm449_vm1 = vcmp.le.f32.partialorder %v276_v2, %v2383_v57 }
 0x438   :  { %vm2037_vm2 = vmpackc.low %vm450_vm15, %vm449_vm1 }
 0x439   :  { %2038 = vmatpush3.bf16.msk.msra.mxu0 %vm2037_vm2, %v2255_v61 }
 0x43a   :  { %v315_v3 = vpop.permute.xlu0 %314  ;;  %v311_v4 = vpop.permute.xlu1 %310  ;;  %2039 = vmatprep.subr.bf16.mxu0 %v2251_v34 }
 0x43b   :  { %vm458_vm3 = vcmp.le.f32.partialorder %v315_v3, %v2389_v60  ;;  %vm457_vm4 = vcmp.le.f32.partialorder %v311_v4, %v2389_v60 }
 0x43c   :  { %vm2049_vm5 = vmpackc.low %vm458_vm3, %vm457_vm4  ;;  %vm543_vm3 = vcmask 523264  }
 0x43d   :  { %2050 = vmatpush3.bf16.msk.msra.mxu1 %vm2049_vm5, %v2255_v61 }
 0x43e   :  { %v288_v5 = vpop.permute.xlu0 %287  ;;  %v284_v6 = vpop.permute.xlu1 %283  ;;  %2051 = vmatprep.subr.bf16.mxu1 %v2251_v34 }
 0x43f   :  { %vm452_vm9 = vcmp.le.f32.partialorder %v288_v5, %v2383_v57  ;;  %vm451_vm10 = vcmp.le.f32.partialorder %v284_v6, %v2383_v57 }
 0x440   :  { %vm2040_vm11 = vmpackc.low %vm452_vm9, %vm451_vm10 }
 0x441   :  { %2041 = vmatpush3.bf16.msk.msra.mxu0 %vm2040_vm11, %v2255_v61 }
 0x442   :  { %v323_v7 = vpop.permute.xlu0 %322  ;;  %v319_v8 = vpop.permute.xlu1 %318  ;;  %2042 = vmatprep.subr.bf16.mxu0 %v2251_v34 }
 0x443   :  { %vm460_vm12 = vcmp.le.f32.partialorder %v323_v7, %v2389_v60  ;;  %vm459_vm13 = vcmp.le.f32.partialorder %v319_v8, %v2389_v60 }
 0x444   :  { %vm2052_vm14 = vmpackc.low %vm460_vm12, %vm459_vm13 }
 0x445   :  { %2053 = vmatpush3.bf16.msk.msra.mxu1 %vm2052_vm14, %v2255_v61 }
 0x446   :  { %v296_v9 = vpop.permute.xlu0 %295  ;;  %v292_v10 = vpop.permute.xlu1 %291  ;;  %2054 = vmatprep.subr.bf16.mxu1 %v2251_v34 }
 0x447   :  { %vm454_vm15 = vcmp.le.f32.partialorder %v296_v9, %v2383_v57  ;;  %vm453_vm1 = vcmp.le.f32.partialorder %v292_v10, %v2383_v57 }
 0x448   :  { %vm2043_vm2 = vmpackc.low %vm454_vm15, %vm453_vm1 }
 0x449   :  { %2044 = vmatpush3.bf16.msk.msra.mxu0 %vm2043_vm2, %v2255_v61 }
 0x44a   :  { %v331_v12 = vpop.permute.xlu0 %330  ;;  %v327_v13 = vpop.permute.xlu1 %326  ;;  %2057 = vmatprep.subr.bf16.mxu0 %v2251_v34 }
 0x44b   :  { %vm462_vm4 = vcmp.le.f32.partialorder %v331_v12, %v2389_v60  ;;  %vm461_vm5 = vcmp.le.f32.partialorder %v327_v13, %v2389_v60 }
 0x44c   :  { %vm2055_vm9 = vmpackc.low %vm462_vm4, %vm461_vm5  ;;  %1898 = vmatmul.mubr.msk.f32.vlgmr.msra.gmra.mrb[0].mxu0 %vm543_vm3, %v2256_v14 }
 0x44d   :  { %2056 = vmatpush3.bf16.msk.msra.mxu1 %vm2055_vm9, %v2255_v61  ;;  %1935 = vmatprep.mubr.msk.f32.mxu0 %vm2252_vm8, %v2253_v43 }
 0x44e   :  { %v342_v17 = vpop.permute.xlu0 %341  ;;  %v338_v18 = vpop.permute.xlu1 %337  ;;  %2069 = vmatprep.subr.bf16.mxu1 %v2251_v34 }
 0x44f   :  { %vm464_vm10 = vcmp.le.f32.partialorder %v342_v17, %v2426_v16  ;;  %vm463_vm11 = vcmp.le.f32.partialorder %v338_v18, %v2426_v16 }
 0x450   :  { %vm2058_vm12 = vmpackc.low %vm464_vm10, %vm463_vm11  ;;  %1917 = vmatmul.mubr.msk.f32.vlgmr.msra.gmra.mrb[0].mxu1 %vm543_vm3, %v2256_v14 }
 0x451   :  { %2059 = vmatpush3.bf16.msk.msra.mxu0 %vm2058_vm12, %v2255_v61  ;;  %1954 = vmatprep.mubr.msk.f32.mxu1 %vm2252_vm8, %v2253_v43 }
 0x452   :  { %v377_v21 = vpop.permute.xlu0 %376  ;;  %v373_v22 = vpop.permute.xlu1 %372  ;;  %2060 = vmatprep.subr.bf16.mxu0 %v2251_v34 }
 0x453   :  { %vm472_vm13 = vcmp.le.f32.partialorder %v377_v21, %v2437_v20  ;;  %vm471_vm14 = vcmp.le.f32.partialorder %v373_v22, %v2437_v20 }
 0x454   :  { %vm2070_vm15 = vmpackc.low %vm472_vm13, %vm471_vm14 }
 0x455   :  { %2071 = vmatpush3.bf16.msk.msra.mxu1 %vm2070_vm15, %v2255_v61 }
 0x456   :  { %v350_v24 = vpop.permute.xlu0 %349  ;;  %v346_v26 = vpop.permute.xlu1 %345  ;;  %2072 = vmatprep.subr.bf16.mxu1 %v2251_v34 }
 0x457   :  { %vm466_vm1 = vcmp.le.f32.partialorder %v350_v24, %v2426_v16  ;;  %vm465_vm2 = vcmp.le.f32.partialorder %v346_v26, %v2426_v16 }
 0x458   :  { %vm2061_vm4 = vmpackc.low %vm466_vm1, %vm465_vm2 }
 0x459   :  { %2062 = vmatpush3.bf16.msk.msra.mxu0 %vm2061_vm4, %v2255_v61 }
 0x45a   :  { %v385_v27 = vpop.permute.xlu0 %384  ;;  %v381_v28 = vpop.permute.xlu1 %380  ;;  %2063 = vmatprep.subr.bf16.mxu0 %v2251_v34 }
 0x45b   :  { %vm474_vm5 = vcmp.le.f32.partialorder %v385_v27, %v2437_v20  ;;  %vm473_vm9 = vcmp.le.f32.partialorder %v381_v28, %v2437_v20  ;;  %v2512_v28 = vsub.s32 %v2345_v35, %v2347_v36 }
 0x45c   :  { %vm2073_vm10 = vmpackc.low %vm474_vm5, %vm473_vm9 }
 0x45d   :  { %2074 = vmatpush3.bf16.msk.msra.mxu1 %vm2073_vm10, %v2255_v61 }
 0x45e   :  { %v358_v29 = vpop.permute.xlu0 %357  ;;  %v354_v30 = vpop.permute.xlu1 %353  ;;  %2075 = vmatprep.subr.bf16.mxu1 %v2251_v34 }
 0x45f   :  { %vm468_vm11 = vcmp.le.f32.partialorder %v358_v29, %v2426_v16  ;;  %vm467_vm12 = vcmp.le.f32.partialorder %v354_v30, %v2426_v16 }
 0x460   :  { %vm2064_vm13 = vmpackc.low %vm468_vm11, %vm467_vm12 }
 0x461   :  { %2065 = vmatpush3.bf16.msk.msra.mxu0 %vm2064_vm13, %v2255_v61 }
 0x462   :  { %v393_v33 = vpop.permute.xlu0 %392  ;;  %v389_v38 = vpop.permute.xlu1 %388  ;;  %2066 = vmatprep.subr.bf16.mxu0 %v2251_v34 }
 0x463   :  { %vm476_vm14 = vcmp.le.f32.partialorder %v393_v33, %v2437_v20  ;;  %vm475_vm15 = vcmp.le.f32.partialorder %v389_v38, %v2437_v20 }
 0x464   :  { %vm2076_vm1 = vmpackc.low %vm476_vm14, %vm475_vm15 }
 0x465   :  { %2077 = vmatpush3.bf16.msk.msra.mxu1 %vm2076_vm1, %v2255_v61  ;;  %vm867_vm1 = vcmask 1041409  }
 0x466   :  { %v366_v39 = vpop.permute.xlu0 %365  ;;  %v362_v41 = vpop.permute.xlu1 %361  ;;  %2078 = vmatprep.subr.bf16.mxu1 %v2251_v34 }
 0x467   :  { %vm470_vm2 = vcmp.le.f32.partialorder %v366_v39, %v2426_v16  ;;  %vm469_vm4 = vcmp.le.f32.partialorder %v362_v41, %v2426_v16 }
 0x468   :  { %vm2067_vm5 = vmpackc.low %vm470_vm2, %vm469_vm4  ;;  %vm869_vm2 = vcmask 1042434   ;;  %vm871_vm4 = vcmask 1043459  }
 0x469   :  { %2068 = vmatpush3.bf16.msk.msra.mxu0 %vm2067_vm5, %v2255_v61  ;;  %vm874_vm5 = vcmask 60416  }
 0x46a   :  { %v401_v42 = vpop.permute.xlu0 %400  ;;  %v397_v46 = vpop.permute.xlu1 %396  ;;  %2081 = vmatprep.subr.bf16.mxu0 %v2251_v34 }
 0x46b   :  { %vm478_vm9 = vcmp.le.f32.partialorder %v401_v42, %v2437_v20  ;;  %vm477_vm10 = vcmp.le.f32.partialorder %v397_v46, %v2437_v20 }
 0x46c   :  { %vm2079_vm11 = vmpackc.low %vm478_vm9, %vm477_vm10  ;;  %1936 = vmatmul.mubr.msk.f32.vlgmr.msra.gmra.mrb[2].mxu0 %vm543_vm3, %v2256_v14 }
 0x46d   :  { %2080 = vmatpush3.bf16.msk.msra.mxu1 %vm2079_vm11, %v2255_v61  ;;  %1973 = vmatprep.mubr.msk.f32.mxu0 %vm2252_vm8, %v2253_v43 }
 0x46e   :  { %2093 = vmatprep.subr.bf16.mxu1 %v2251_v34 }
 0x470   :  { %1955 = vmatmul.mubr.msk.f32.vlgmr.msra.gmra.mrb[2].mxu1 %vm543_vm3, %v2256_v14 }
 0x471   :  { %1992 = vmatprep.mubr.msk.f32.mxu1 %vm2252_vm8, %v2253_v43 }
 0x4a9   :  { %v113_v47 = vpop.xlane.xlu1 %112 }
 0x4aa   :  { %v115_v48 = vmul.f32 0.015625, %v113_v47 }
 0x4ac   :  { %v116_v49 = vsub.f32 %v2306_v0, %v115_v48 }
 0x4ae   :  { %118 = vrot.lane.b32.xlu0 %v116_v49, %s2248_s5  ;;  %v117_v50 = vmul.f32 %v116_v49, %v116_v49 }
 0x4b2   :  { %166 = vrot.lane.b32.xlu0 %v117_v50, %s2248_s5 }
 0x51f   :  { %v613_v51 = vpop.f32.mrb[0].mxu0 }
 0x520   :  { %v119_v53 = vpop.permute.xlu0 %118  ;;  %v1899_v54 = vpop.f32.mrb[1].mxu0  ;;  %vm827_vm15 = vcmp.ge.f32.partialorder %v613_v51, 31.0 }
 0x521   :  { %v120_v55 = vsel %vm75_vm6, %v119_v53, %v116_v49  ;;  %v831_v17 = vsel %vm827_vm15, %v2383_v57, inf }
 0x522   :  { %121 = vrot.lane.b32.xlu0 %v120_v55, %s2248_s5  ;;  %v835_v18 = vsel %vm543_vm3, %v831_v17, inf }
 0x523   :  { %v683_v56 = vpop.f32.mrb[0].mxu1 }
 0x524   :  { %vm828_vm12 = vcmp.ge.f32.partialorder %v683_v56, 31.0  ;;  %v167_v58 = vpop.permute.xlu0 %166  ;;  %v1918_v59 = vpop.f32.mrb[1].mxu1 }
 0x525   :  { %v168_v62 = vsel %vm75_vm6, %v167_v58, %v117_v50  ;;  %v832_v0 = vsel %vm828_vm12, %v2389_v60, inf }
 0x526   :  { %169 = vrot.lane.b32.xlu0 %v168_v62, %s2248_s5  ;;  %v838_v63 = vsel %vm543_vm3, %v832_v0, inf }
 0x527   :  { %839 = vmin.xlane.f32.xlu1 %v838_v63 }
 0x53f   :  { %v753_v1 = vpop.f32.mrb[2].mxu0 }
 0x540   :  { %vm829_vm13 = vcmp.ge.f32.partialorder %v753_v1, 31.0  ;;  %v1937_v2 = vpop.f32.mrb[3].mxu0 }
 0x541   :  { %v833_v3 = vsel %vm829_vm13, %v2426_v16, inf }
 0x542   :  { %v841_v4 = vsel %vm543_vm3, %v833_v3, inf }
 0x543   :  { %842 = vmin.xlane.f32.xlu1 %v841_v4  ;;  %v823_v5 = vpop.f32.mrb[2].mxu1 }
 0x544   :  { %vm830_vm14 = vcmp.ge.f32.partialorder %v823_v5, 31.0  ;;  %v1956_v6 = vpop.f32.mrb[3].mxu1 }
 0x545   :  { %v834_v7 = vsel %vm830_vm14, %v2437_v20, inf }
 0x546   :  { %v844_v60 = vsel %vm543_vm3, %v834_v7, inf }
 0x547   :  { %845 = vmin.xlane.f32.xlu1 %v844_v60 }
 0x594   :  { %v122_v8 = vpop.permute.xlu0 %121 }
 0x595   :  { %v2493_v9 = vsel %vm75_vm6, %v122_v8, %v116_v49 }
 0x596   :  { %125 = vrot.lane.b32.xlu0 %v2493_v9, %s2250_s7 }
 0x598   :  { %v170_v10 = vpop.permute.xlu0 %169 }
 0x599   :  { %v2498_v11 = vsel %vm75_vm6, %v170_v10, %v117_v50 }
 0x59a   :  { %173 = vrot.lane.b32.xlu0 %v2498_v11, %s2250_s7 }
 0x5b4   :  { %v840_v26 = vpop.xlane.xlu1 %839 }
 0x5b5   :  { %v858_v30 = vrot.slane %v840_v26, %v2512_v28 }
 0x5d0   :  { %v843_v27 = vpop.xlane.xlu1 %842 }
 0x5d1   :  { %v862_v38 = vrot.slane %v843_v27, %v2512_v28 }
 0x5d4   :  { %v846_v57 = vpop.xlane.xlu1 %845 }
 0x5d5   :  { %v866_v39 = vrot.slane %v846_v57, %v2512_v28 }
 0x608   :  { %v126_v12 = vpop.permute.xlu0 %125 }
 0x609   :  { %v128_v13 = vadd.f32 %v126_v12, %v116_v49 }
 0x60b   :  { %129 = vrot.lane.b32.xlu0 %v128_v13, %s2248_s5 }
 0x60c   :  { %v174_v15 = vpop.permute.xlu0 %173 }
 0x60d   :  { %v176_v16 = vadd.f32 %v174_v15, %v117_v50 }
 0x60f   :  { %177 = vrot.lane.b32.xlu0 %v176_v16, %s2248_s5 }
 0x62e   :  { %836 = vmin.xlane.f32.xlu0 %v835_v18 }
 0x67d   :  { %v130_v20 = vpop.permute.xlu0 %129 }
 0x67e   :  { %v131_v21 = vsel %vm75_vm6, %v130_v20, %v128_v13 }
 0x67f   :  { %132 = vrot.lane.b32.xlu1 %v131_v21, %s2248_s5 }
 0x681   :  { %v178_v22 = vpop.permute.xlu0 %177 }
 0x682   :  { %v179_v24 = vsel %vm75_vm6, %v178_v22, %v176_v16 }
 0x683   :  { %180 = vrot.lane.b32.xlu0 %v179_v24, %s2248_s5 }
 0x6bb   :  { %v837_v29 = vpop.xlane.xlu0 %836 }
 0x6bc   :  { %v854_v33 = vrot.slane %v837_v29, %v2512_v28 }
 0x6be   :  { %v868_v41 = vsel %vm867_vm1, %v858_v30, %v854_v33 }
 0x6bf   :  { %v870_v42 = vsel %vm869_vm2, %v862_v38, %v868_v41 }
 0x6c0   :  { %v872_v46 = vsel %vm871_vm4, %v866_v39, %v870_v42 }
 0x6c1   :  { %v875_v47 = vsel %vm874_vm5, %v872_v46, inf }
 0x6c2   :  { %876 = vmin.xlane.f32.xlu1 %v875_v47 }
 0x6f1   :  { %v133_v48 = vpop.permute.xlu1 %132 }
 0x6f2   :  { %v134_v49 = vsel %vm75_vm6, %v133_v48, %v128_v13 }
 0x6f3   :  { %136 = vrot.lane.b32.xlu0 %v134_v49, %s2257_s8 }
 0x6f5   :  { %v181_v50 = vpop.permute.xlu0 %180 }
 0x6f6   :  { %v182_v51 = vsel %vm75_vm6, %v181_v50, %v176_v16 }
 0x6f7   :  { %184 = vrot.lane.b32.xlu0 %v182_v51, %s2257_s8 }
 0x74f   :  { %v2524_v53 = vpop.xlane.xlu1 %876 }
 0x750   :  { %v878_v54 = vsub.f32 %v2337_v31, %v2524_v53 }
 0x752   :  { %v879_v55 = vand.u32 2147483647, %v878_v54 }
 0x754   :  { %881 = vrot.lane.b32.xlu0 %v879_v55, %s2250_s7 }
 0x765   :  { %v137_v56 = vpop.permute.xlu0 %136 }
 0x766   :  { %v2529_v58 = vadd.f32 %v137_v56, %v128_v13 }
 0x768   :  { %140 = vrot.lane.b32.xlu0 %v2529_v58, %s2248_s5 }
 0x769   :  { %v185_v59 = vpop.permute.xlu0 %184 }
 0x76a   :  { %v2533_v62 = vadd.f32 %v185_v59, %v176_v16 }
 0x76c   :  { %188 = vrot.lane.b32.xlu1 %v2533_v62, %s2248_s5 }
 0x7c6   :  { %v882_v0 = vpop.permute.xlu0 %881 }
 0x7c7   :  { %v884_v1 = vsel %vm2763_vm7, %v882_v0, inf }
 0x7c8   :  { %v888_v3 = vrot.slane %v884_v1, %v2351_v37  ;;  %v923_v6 = vrot.slane %v884_v1, %v299_v40  ;;  %v958_v7 = vrot.slane %v884_v1, %v334_v44  ;;  %v993_v60 = vrot.slane %v884_v1, %v369_v45 }
 0x7c9   :  { %v1032_v44 = vrot.slane %v884_v1, %v2372_v52 }
 0x7cb   :  { %v2558_v12 = vrot.slane %v1032_v44, %v2372_v52  ;;  %v1033_v16 = vcombine.high %v1032_v44, %v1032_v44 }
 0x7cd   :  { %v2562_v17 = vrot.slane %v2558_v12, %v2351_v37  ;;  %v2567_v21 = vrot.slane %v1033_v16, %v2372_v52  ;;  %v1048_v46 = vcombine.high %v2558_v12, %v2558_v12 }
 0x7cf   :  { %v2573_v26 = vrot.slane %v2567_v21, %v2351_v37  ;;  %v1049_v49 = vcombine.high %v2567_v21, %v2567_v21  ;;  %v2608_v50 = vrot.slane %v1048_v46, %v2351_v37 }
 0x7d1   :  { %v2619_v55 = vrot.slane %v1049_v49, %v2351_v37 }
 0x7da   :  { %v141_v63 = vpop.permute.xlu0 %140 }
 0x7db   :  { %v142_v2 = vsel %vm75_vm6, %v141_v63, %v2529_v58 }
 0x7dc   :  { %143 = vrot.lane.b32.xlu1 %v142_v2, %s2248_s5 }
 0x7de   :  { %v189_v4 = vpop.permute.xlu1 %188 }
 0x7df   :  { %v190_v5 = vsel %vm75_vm6, %v189_v4, %v2533_v62 }
 0x7e0   :  { %898 = vbcast.lane.b32.xlu1 %v888_v3, 272  ;;  %191 = vrot.lane.b32.xlu0 %v190_v5, %s2248_s5 }
 0x7e4   :  { %933 = vbcast.lane.b32.xlu1 %v923_v6, 272  ;;  %890 = vbcast.lane.b32.xlu0 %v888_v3, 256 }
 0x7e8   :  { %906 = vbcast.lane.b32.xlu1 %v888_v3, 288  ;;  %894 = vbcast.lane.b32.xlu0 %v888_v3, 264 }
 0x7ec   :  { %941 = vbcast.lane.b32.xlu1 %v923_v6, 288  ;;  %925 = vbcast.lane.b32.xlu0 %v923_v6, 256 }
 0x7f0   :  { %914 = vbcast.lane.b32.xlu1 %v888_v3, 304  ;;  %929 = vbcast.lane.b32.xlu0 %v923_v6, 264 }
 0x7f4   :  { %949 = vbcast.lane.b32.xlu1 %v923_v6, 304  ;;  %902 = vbcast.lane.b32.xlu0 %v888_v3, 280 }
 0x7f8   :  { %960 = vbcast.lane.b32.xlu1 %v958_v7, 256  ;;  %937 = vbcast.lane.b32.xlu0 %v923_v6, 280 }
 0x7fc   :  { %995 = vbcast.lane.b32.xlu1 %v993_v60, 256  ;;  %910 = vbcast.lane.b32.xlu0 %v888_v3, 296 }
 0x800   :  { %972 = vbcast.lane.b32.xlu1 %v958_v7, 280  ;;  %945 = vbcast.lane.b32.xlu0 %v923_v6, 296 }
 0x804   :  { %1007 = vbcast.lane.b32.xlu1 %v993_v60, 280  ;;  %918 = vbcast.lane.b32.xlu0 %v888_v3, 312 }
 0x808   :  { %976 = vbcast.lane.b32.xlu1 %v958_v7, 288  ;;  %953 = vbcast.lane.b32.xlu0 %v923_v6, 312 }
 0x80c   :  { %1011 = vbcast.lane.b32.xlu1 %v993_v60, 288  ;;  %964 = vbcast.lane.b32.xlu0 %v958_v7, 264 }
 0x810   :  { %984 = vbcast.lane.b32.xlu1 %v958_v7, 304  ;;  %999 = vbcast.lane.b32.xlu0 %v993_v60, 264 }
 0x814   :  { %1019 = vbcast.lane.b32.xlu1 %v993_v60, 304  ;;  %968 = vbcast.lane.b32.xlu0 %v958_v7, 272 }
 0x818   :  { %1003 = vbcast.lane.b32.xlu0 %v993_v60, 272 }
 0x81c   :  { %980 = vbcast.lane.b32.xlu0 %v958_v7, 296 }
 0x820   :  { %1015 = vbcast.lane.b32.xlu0 %v993_v60, 296 }
 0x824   :  { %988 = vbcast.lane.b32.xlu0 %v958_v7, 312 }
 0x828   :  { %1023 = vbcast.lane.b32.xlu0 %v993_v60, 312 }
 0x84e   :  { %v144_v36 = vpop.permute.xlu1 %143 }
 0x84f   :  { %v145_v40 = vsel %vm75_vm6, %v144_v36, %v2529_v58 }
 0x850   :  { %147 = vrot.lane.b32.xlu1 %v145_v40, %s2258_s9 }
 0x852   :  { %v192_v45 = vpop.permute.xlu0 %191  ;;  %v899_v8 = vpop.permute.xlu1 %898 }
 0x853   :  { %v193_v10 = vsel %vm75_vm6, %v192_v45, %v2533_v62  ;;  %vm1072_vm15 = vcmp.le.f32.partialorder %v899_v8, %v2562_v17 }
 0x854   :  { %195 = vrot.lane.b32.xlu0 %v193_v10, %s2258_s9 }
 0x856   :  { %v891_v13 = vpop.permute.xlu0 %890  ;;  %v934_v15 = vpop.permute.xlu1 %933 }
 0x857   :  { %vm1070_vm9 = vcmp.le.f32.partialorder %v891_v13, %v2562_v17 }
 0x85a   :  { %v895_v18 = vpop.permute.xlu0 %894  ;;  %v907_v20 = vpop.permute.xlu1 %906 }
 0x85b   :  { %vm1071_vm10 = vcmp.le.f32.partialorder %v895_v18, %v2562_v17 }
 0x85c   :  { %vm2082_vm11 = vmpackc.low %vm1071_vm10, %vm1070_vm9 }
 0x85d   :  { %2083 = vmatpush3.bf16.msk.msra.mxu0 %vm2082_vm11, %v2255_v61  ;;  %vm1080_vm11 = vcmp.le.f32.partialorder %v934_v15, %v2573_v26 }
 0x85e   :  { %v926_v22 = vpop.permute.xlu0 %925  ;;  %v942_v24 = vpop.permute.xlu1 %941  ;;  %2084 = vmatprep.subr.bf16.mxu0 %v2251_v34 }
 0x85f   :  { %vm1078_vm12 = vcmp.le.f32.partialorder %v926_v22, %v2573_v26 }
 0x862   :  { %v930_v27 = vpop.permute.xlu0 %929  ;;  %v915_v57 = vpop.permute.xlu1 %914 }
 0x863   :  { %vm1079_vm13 = vcmp.le.f32.partialorder %v930_v27, %v2573_v26  ;;  %v2261_v27 = vmov 49  }
 0x864   :  { %vm2094_vm14 = vmpackc.low %vm1079_vm13, %vm1078_vm12  ;;  %2166 = vset.pattern.permute.xlu1 %v2261_v27 }
 0x865   :  { %2095 = vmatpush3.bf16.msk.msra.mxu1 %vm2094_vm14, %v2255_v61  ;;  %vm1074_vm14 = vcmp.le.f32.partialorder %v907_v20, %v2562_v17 }
 0x866   :  { %v903_v52 = vpop.permute.xlu0 %902  ;;  %2096 = vmatprep.subr.bf16.mxu1 %v2251_v34  ;;  %v950_v29 = vpop.permute.xlu1 %949 }
 0x867   :  { %vm1073_vm9 = vcmp.le.f32.partialorder %v903_v52, %v2562_v17  ;;  %v2262_v52 = vmov 0  }
 0x868   :  { %vm2085_vm10 = vmpackc.low %vm1073_vm9, %vm1072_vm15  ;;  %2168 = vset.pattern.permute.xlu0 %v2262_v52 }
 0x869   :  { %2086 = vmatpush3.bf16.msk.msra.mxu0 %vm2085_vm10, %v2255_v61  ;;  %vm1082_vm10 = vcmp.le.f32.partialorder %v942_v24, %v2573_v26 }
 0x86a   :  { %v938_v30 = vpop.permute.xlu0 %937  ;;  %2087 = vmatprep.subr.bf16.mxu0 %v2251_v34  ;;  %v961_v33 = vpop.permute.xlu1 %960 }
 0x86b   :  { %vm1081_vm12 = vcmp.le.f32.partialorder %v938_v30, %v2573_v26 }
 0x86c   :  { %vm2097_vm13 = vmpackc.low %vm1081_vm12, %vm1080_vm11 }
 0x86d   :  { %2098 = vmatpush3.bf16.msk.msra.mxu1 %vm2097_vm13, %v2255_v61  ;;  %vm1076_vm13 = vcmp.le.f32.partialorder %v915_v57, %v2562_v17 }
 0x86e   :  { %v911_v38 = vpop.permute.xlu0 %910  ;;  %2099 = vmatprep.subr.bf16.mxu1 %v2251_v34  ;;  %v996_v41 = vpop.permute.xlu1 %995 }
 0x86f   :  { %vm1075_vm15 = vcmp.le.f32.partialorder %v911_v38, %v2562_v17 }
 0x870   :  { %vm2088_vm9 = vmpackc.low %vm1075_vm15, %vm1074_vm14 }
 0x871   :  { %2089 = vmatpush3.bf16.msk.msra.mxu0 %vm2088_vm9, %v2255_v61  ;;  %vm1084_vm9 = vcmp.le.f32.partialorder %v950_v29, %v2573_v26 }
 0x872   :  { %v946_v39 = vpop.permute.xlu0 %945  ;;  %2090 = vmatprep.subr.bf16.mxu0 %v2251_v34  ;;  %v973_v47 = vpop.permute.xlu1 %972 }
 0x873   :  { %vm1083_vm11 = vcmp.le.f32.partialorder %v946_v39, %v2573_v26 }
 0x874   :  { %vm2100_vm12 = vmpackc.low %vm1083_vm11, %vm1082_vm10 }
 0x875   :  { %2101 = vmatpush3.bf16.msk.msra.mxu1 %vm2100_vm12, %v2255_v61  ;;  %vm1086_vm12 = vcmp.le.f32.partialorder %v961_v33, %v2608_v50 }
 0x876   :  { %v919_v42 = vpop.permute.xlu0 %918  ;;  %2102 = vmatprep.subr.bf16.mxu1 %v2251_v34  ;;  %v1008_v54 = vpop.permute.xlu1 %1007 }
 0x877   :  { %vm1077_vm14 = vcmp.le.f32.partialorder %v919_v42, %v2562_v17 }
 0x878   :  { %vm2091_vm15 = vmpackc.low %vm1077_vm14, %vm1076_vm13 }
 0x879   :  { %2092 = vmatpush3.bf16.msk.msra.mxu0 %vm2091_vm15, %v2255_v61  ;;  %vm1094_vm15 = vcmp.le.f32.partialorder %v996_v41, %v2619_v55 }
 0x87a   :  { %v954_v48 = vpop.permute.xlu0 %953  ;;  %2105 = vmatprep.subr.bf16.mxu0 %v2251_v34  ;;  %v977_v59 = vpop.permute.xlu1 %976 }
 0x87b   :  { %vm1085_vm10 = vcmp.le.f32.partialorder %v954_v48, %v2573_v26 }
 0x87c   :  { %vm2103_vm11 = vmpackc.low %vm1085_vm10, %vm1084_vm9  ;;  %1974 = vmatmul.mubr.msk.f32.vlgmr.msra.gmra.mrb[4].mxu0 %vm543_vm3, %v2256_v14 }
 0x87d   :  { %2104 = vmatpush3.bf16.msk.msra.mxu1 %vm2103_vm11, %v2255_v61  ;;  %2011 = vmatprep.mubr.msk.f32.mxu0 %vm2252_vm8, %v2253_v43  ;;  %vm1089_vm11 = vcmp.le.f32.partialorder %v973_v47, %v2608_v50 }
 0x87e   :  { %v965_v51 = vpop.permute.xlu0 %964  ;;  %2117 = vmatprep.subr.bf16.mxu1 %v2251_v34  ;;  %v1012_v63 = vpop.permute.xlu1 %1011 }
 0x87f   :  { %vm1087_vm13 = vcmp.le.f32.partialorder %v965_v51, %v2608_v50 }
 0x880   :  { %vm2106_vm14 = vmpackc.low %vm1087_vm13, %vm1086_vm12  ;;  %1993 = vmatmul.mubr.msk.f32.vlgmr.msra.gmra.mrb[4].mxu1 %vm543_vm3, %v2256_v14 }
 0x881   :  { %2107 = vmatpush3.bf16.msk.msra.mxu0 %vm2106_vm14, %v2255_v61  ;;  %2030 = vmatprep.mubr.msk.f32.mxu1 %vm2252_vm8, %v2253_v43  ;;  %vm1097_vm8 = vcmp.le.f32.partialorder %v1008_v54, %v2619_v55 }
 0x882   :  { %v1000_v56 = vpop.permute.xlu0 %999  ;;  %2108 = vmatprep.subr.bf16.mxu0 %v2251_v34  ;;  %v985_v2 = vpop.permute.xlu1 %984 }
 0x883   :  { %vm1095_vm9 = vcmp.le.f32.partialorder %v1000_v56, %v2619_v55 }
 0x884   :  { %vm2118_vm10 = vmpackc.low %vm1095_vm9, %vm1094_vm15  ;;  %vm1090_vm9 = vcmp.le.f32.partialorder %v977_v59, %v2608_v50 }
 0x885   :  { %2119 = vmatpush3.bf16.msk.msra.mxu1 %vm2118_vm10, %v2255_v61 }
 0x886   :  { %v969_v0 = vpop.permute.xlu0 %968  ;;  %2120 = vmatprep.subr.bf16.mxu1 %v2251_v34  ;;  %v1020_v5 = vpop.permute.xlu1 %1019 }
 0x887   :  { %vm1088_vm12 = vcmp.le.f32.partialorder %v969_v0, %v2608_v50 }
 0x888   :  { %vm2109_vm13 = vmpackc.low %vm1089_vm11, %vm1088_vm12  ;;  %vm1098_vm12 = vcmp.le.f32.partialorder %v1012_v63, %v2619_v55 }
 0x889   :  { %2110 = vmatpush3.bf16.msk.msra.mxu0 %vm2109_vm13, %v2255_v61 }
 0x88a   :  { %v1004_v37 = vpop.permute.xlu0 %1003  ;;  %2111 = vmatprep.subr.bf16.mxu0 %v2251_v34 }
 0x88b   :  { %vm1096_vm14 = vcmp.le.f32.partialorder %v1004_v37, %v2619_v55 }
 0x88c   :  { %vm2121_vm15 = vmpackc.low %vm1097_vm8, %vm1096_vm14  ;;  %vm1092_vm14 = vcmp.le.f32.partialorder %v985_v2, %v2608_v50 }
 0x88d   :  { %2122 = vmatpush3.bf16.msk.msra.mxu1 %vm2121_vm15, %v2255_v61 }
 0x88e   :  { %v981_v1 = vpop.permute.xlu0 %980  ;;  %2123 = vmatprep.subr.bf16.mxu1 %v2251_v34 }
 0x88f   :  { %vm1091_vm10 = vcmp.le.f32.partialorder %v981_v1, %v2608_v50 }
 0x890   :  { %vm2112_vm11 = vmpackc.low %vm1091_vm10, %vm1090_vm9  ;;  %vm1100_vm10 = vcmp.le.f32.partialorder %v1020_v5, %v2619_v55 }
 0x891   :  { %2113 = vmatpush3.bf16.msk.msra.mxu0 %vm2112_vm11, %v2255_v61 }
 0x892   :  { %v1016_v3 = vpop.permute.xlu0 %1015  ;;  %2114 = vmatprep.subr.bf16.mxu0 %v2251_v34 }
 0x893   :  { %vm1099_vm13 = vcmp.le.f32.partialorder %v1016_v3, %v2619_v55 }
 0x894   :  { %vm2124_vm8 = vmpackc.low %vm1099_vm13, %vm1098_vm12 }
 0x895   :  { %2125 = vmatpush3.bf16.msk.msra.mxu1 %vm2124_vm8, %v2255_v61 }
 0x896   :  { %v989_v4 = vpop.permute.xlu0 %988  ;;  %2126 = vmatprep.subr.bf16.mxu1 %v2251_v34 }
 0x897   :  { %vm1093_vm15 = vcmp.le.f32.partialorder %v989_v4, %v2608_v50 }
 0x898   :  { %vm2115_vm9 = vmpackc.low %vm1093_vm15, %vm1092_vm14 }
 0x899   :  { %2116 = vmatpush3.bf16.msk.msra.mxu0 %vm2115_vm9, %v2255_v61 }
 0x89a   :  { %v1024_v6 = vpop.permute.xlu0 %1023 }
 0x89b   :  { %vm1101_vm11 = vcmp.le.f32.partialorder %v1024_v6, %v2619_v55 }
 0x89c   :  { %vm2127_vm7 = vmpackc.low %vm1101_vm11, %vm1100_vm10  ;;  %2012 = vmatmul.mubr.msk.f32.vlgmr.msra.gmra.mrb[6].mxu0 %vm543_vm3, %v2256_v14 }
 0x89d   :  { %2128 = vmatpush3.bf16.msk.msra.mxu1 %vm2127_vm7, %v2255_v61 }
 0x8a0   :  { %2031 = vmatmul.mubr.msk.f32.vlgmr.msra.gmra.mrb[6].mxu1 %vm543_vm3, %v2256_v14 }
 0x8c2   :  { %v148_v34 = vpop.permute.xlu1 %147 }
 0x8c3   :  { %v150_v7 = vadd.f32 %v148_v34, %v2529_v58 }
 0x8c5   :  { %151 = vrot.lane.b32.xlu1 %v150_v7, %s2248_s5 }
 0x8c6   :  { %v196_v60 = vpop.permute.xlu0 %195 }
 0x8c7   :  { %v198_v36 = vadd.f32 %v196_v60, %v2533_v62 }
 0x8c9   :  { %199 = vrot.lane.b32.xlu0 %v198_v36, %s2248_s5 }
 0x937   :  { %v152_v40 = vpop.permute.xlu1 %151 }
 0x938   :  { %v153_v44 = vsel %vm75_vm6, %v152_v40, %v150_v7 }
 0x939   :  { %154 = vrot.lane.b32.xlu1 %v153_v44, %s2248_s5 }
 0x93b   :  { %v200_v45 = vpop.permute.xlu0 %199 }
 0x93c   :  { %v201_v61 = vsel %vm75_vm6, %v200_v45, %v198_v36 }
 0x93d   :  { %202 = vrot.lane.b32.xlu0 %v201_v61, %s2248_s5 }
 0x941   :  { %162 = vrot.lane.b32.xlu0 %v2493_v9, %s2259_s10 }
 0x945   :  { %210 = vrot.lane.b32.xlu0 %v2498_v11, %s2259_s10 }
 0x94f   :  { %v1232_v14 = vpop.f32.mrb[4].mxu0 }
 0x950   :  { %v1975_v58 = vpop.f32.mrb[5].mxu0  ;;  %vm1446_vm8 = vcmp.ge.f32.partialorder %v1232_v14, 31.0 }
 0x951   :  { %v1450_v29 = vsel %vm1446_vm8, %v2562_v17, inf }
 0x952   :  { %v1454_v30 = vsel %vm543_vm3, %v1450_v29, inf }
 0x953   :  { %v1302_v62 = vpop.f32.mrb[4].mxu1 }
 0x954   :  { %v1994_v8 = vpop.f32.mrb[5].mxu1  ;;  %vm1447_vm7 = vcmp.ge.f32.partialorder %v1302_v62, 31.0 }
 0x955   :  { %v1451_v10 = vsel %vm1447_vm7, %v2573_v26, inf }
 0x956   :  { %v1457_v12 = vsel %vm543_vm3, %v1451_v10, inf }
 0x964   :  { %1458 = vmin.xlane.f32.xlu0 %v1457_v12 }
 0x96f   :  { %v1372_v13 = vpop.f32.mrb[6].mxu0 }
 0x970   :  { %vm1448_vm12 = vcmp.ge.f32.partialorder %v1372_v13, 31.0  ;;  %v2013_v15 = vpop.f32.mrb[7].mxu0 }
 0x971   :  { %v1452_v16 = vsel %vm1448_vm12, %v2608_v50, inf }
 0x972   :  { %v1460_v18 = vsel %vm543_vm3, %v1452_v16, inf }
 0x973   :  { %1461 = vmin.xlane.f32.xlu0 %v1460_v18  ;;  %v1442_v9 = vpop.f32.mrb[6].mxu1 }
 0x974   :  { %vm1449_vm13 = vcmp.ge.f32.partialorder %v1442_v9, 31.0  ;;  %v2032_v11 = vpop.f32.mrb[7].mxu1 }
 0x975   :  { %v1453_v20 = vsel %vm1449_vm13, %v2619_v55, inf  ;;  %v2173_v11 = vld [vmem:[#allocation5] sm:$0xf] }
 0x976   :  { %v1463_v21 = vsel %vm543_vm3, %v1453_v20, inf }
 0x977   :  { %1464 = vmin.xlane.f32.xlu0 %v1463_v21 }
 0x9ab   :  { %v155_v22 = vpop.permute.xlu1 %154 }
 0x9ac   :  { %v156_v24 = vsel %vm75_vm6, %v155_v22, %v150_v7 }
 0x9ad   :  { %158 = vrot.lane.b32.xlu1 %v156_v24, %s2260_s11 }
 0x9af   :  { %v203_v26 = vpop.permute.xlu0 %202 }
 0x9b0   :  { %v204_v57 = vsel %vm75_vm6, %v203_v26, %v198_v36 }
 0x9b1   :  { %206 = vrot.lane.b32.xlu1 %v204_v57, %s2260_s11 }
 0x9b3   :  { %v163_v33 = vpop.permute.xlu0 %162 }
 0x9b7   :  { %v211_v48 = vpop.permute.xlu0 %210 }
 0x9d5   :  { %1455 = vmin.xlane.f32.xlu1 %v1454_v30 }
 0x9f1   :  { %v1459_v17 = vpop.xlane.xlu0 %1458 }
 0x9f2   :  { %v1477_v37 = vrot.slane %v1459_v17, %v2512_v28 }
 0xa00   :  { %v1462_v56 = vpop.xlane.xlu0 %1461 }
 0xa01   :  { %v1481_v1 = vrot.slane %v1462_v56, %v2512_v28 }
 0xa04   :  { %v1465_v59 = vpop.xlane.xlu0 %1464 }
 0xa05   :  { %v1485_v2 = vrot.slane %v1465_v59, %v2512_v28 }
 0xa1f   :  { %v159_v38 = vpop.permute.xlu1 %158 }
 0xa20   :  { %v161_v39 = vadd.f32 %v159_v38, %v150_v7 }
 0xa22   :  { %v165_v41 = vsub.f32 %v161_v39, %v163_v33 }
 0xa23   :  { %v207_v42 = vpop.permute.xlu1 %206 }
 0xa24   :  { %v214_v46 = vmul.f32 %v165_v41, %v165_v41  ;;  %v209_v47 = vadd.f32 %v207_v42, %v198_v36 }
 0xa26   :  { %v215_v49 = vmul.f32 0.06666667, %v214_v46  ;;  %v213_v50 = vsub.f32 %v209_v47, %v211_v48 }
 0xa28   :  { %v216_v51 = vsub.f32 %v213_v50, %v215_v49  ;;  %v109_v50 = vand.u32 2147483647, %v2328_v25  ;;  %v1547_v25 = vmul.f32 %v2337_v31, %v2337_v31 }
 0xa2a   :  { %v217_v54 = vmul.f32 0.071428575, %v216_v51 }
 0xa2c   :  { %v218_v55 = vmax.f32 %v217_v54, 0.0 }
 0xa2e   :  { %219 = vrot.lane.b32.xlu1 %v218_v55, %s2248_s5 }
 0xa32   :  { %229 = vperm.xlu1 %2166, %v218_v55  }
 0xa36   :  { %2167 = vset.pattern.permute.xlu1 %v2262_v52 }
 0xa37   :  { %238 = vperm.xlu1 %2167, %v218_v55  }
 0xa62   :  { %v1456_v0 = vpop.xlane.xlu1 %1455 }
 0xa63   :  { %v1473_v63 = vrot.slane %v1456_v0, %v2512_v28 }
 0xa65   :  { %v1486_v3 = vsel %vm867_vm1, %v1477_v37, %v1473_v63  ;;  %vm226_vm1 = vcmp.gt.s32.totalorder %v2345_v35, 56 }
 0xa66   :  { %v1487_v4 = vsel %vm869_vm2, %v1481_v1, %v1486_v3  ;;  %vm225_vm2 = vcmp.lt.s32.totalorder %v2345_v35, 7 }
 0xa67   :  { %v1488_v5 = vsel %vm871_vm4, %v1485_v2, %v1487_v4  ;;  %vm2764_vm4 = vcmp.le.s32.totalorder %v2345_v35, 61 }
 0xa68   :  { %v1490_v6 = vsel %vm874_vm5, %v1488_v5, inf  ;;  %vm2765_vm15 = vmmov %vm2764_vm4 }
 0xa69   :  { %1491 = vmin.xlane.f32.xlu0 %v1490_v6  ;;  %vm2766_vm9 = vmmov %vm2764_vm4 }
 0xaa0   :  { %v220_v34 = vpop.permute.xlu1 %219 }
 0xaa1   :  { %v221_v7 = vsel %vm75_vm6, %v220_v34, %v218_v55 }
 0xaa2   :  { %222 = vrot.lane.b32.xlu0 %v221_v7, %s2248_s5 }
 0xab1   :  { %v230_v61 = vpop.permute.xlu1 %229 }
 0xab6   :  { %v239_v14 = vpop.permute.xlu1 %238 }
 0xaf6   :  { %v1492_v60 = vpop.xlane.xlu0 %1491 }
 0xaf7   :  { %v1493_v36 = vmul.f32 2.5, %v1492_v60 }
 0xaf9   :  { %v1494_v40 = vadd.f32 %v1493_v36, %v2524_v53 }
 0xafb   :  { %vm1495_vm3 = vcmp.gt.f32.partialorder %v256_v32, %v1494_v40 }
 0xafc   :  { %v1807_v45 = vsel %vm1495_vm3, 1.0, %v2253_v43 }
 0xb14   :  { %v223_v44 = vpop.permute.xlu0 %222 }
 0xb15   :  { %v224_v28 = vsel %vm75_vm6, %v223_v44, %v218_v55 }
 0xb16   :  { %233 = vrot.lane.b32.xlu1 %v224_v28, %s2263_s12 }
 0xb1a   :  { %1499 = vrot.lane.b32.xlu1 %v1807_v45, %s2250_s7 }
 0xb88   :  { %v234_v58 = vpop.permute.xlu1 %233 }
 0xb89   :  { %v236_v53 = vsel %vm226_vm1, %v230_v61, %v234_v58  ;;  %v1529_v61 = vsub.f32 %v2314_v19, %v2173_v11 }
 0xb8a   :  { %v241_v62 = vsel %vm225_vm2, %v239_v14, %v236_v53 }
 0xb8b   :  { %v242_v8 = vsel %vm46_vm0, %v241_v62, -inf  ;;  %v1530_v14 = vmul.f32 %v1529_v61, %v1529_v61 }
 0xb8c   :  { %243 = vmax.xlane.f32.xlu0 %v242_v8  ;;  %v1500_v10 = vpop.permute.xlu1 %1499 }
 0xb8d   :  { %v1502_v32 = vsel %vm2764_vm4, %v1500_v10, 0.0 }
 0xb8e   :  { %1503 = vrot.lane.b32.xlu1 %v1502_v32, %s2248_s5 }
 0xc00   :  { %v1504_v12 = vpop.permute.xlu1 %1503 }
 0xc01   :  { %v1505_v13 = vsel %vm75_vm6, %v1504_v12, %v1502_v32 }
 0xc02   :  { %1506 = vrot.lane.b32.xlu1 %v1505_v13, %s2248_s5 }
 0xc19   :  { %v244_v15 = vpop.xlane.xlu0 %243 }
 0xc1a   :  { %v245_v16 = vadd.f32 1e-08, %v244_v15 }
 0xc1c   :  { %v246_v18 = vmul.f32 0.05, %v245_v16 }
 0xc1e   :  { %vm247_vm5 = vcmp.lt.f32.partialorder %v241_v62, %v246_v18  ;;  %v1531_v62 = vmul.f32 0.00390625, %v1530_v14 }
 0xc1f   :  { %v1670_v9 = vsel %vm247_vm5, 1.0, %v2253_v43 }
 0xc20   :  { %250 = vrot.lane.b32.xlu1 %v1670_v9, %s2248_s5 }
 0xc24   :  { %82 = vrot.lane.b32.xlu1 %v2173_v11, %s2248_s5 }
 0xc74   :  { %v1507_v20 = vpop.permute.xlu1 %1506 }
 0xc75   :  { %v1508_v21 = vsel %vm75_vm6, %v1507_v20, %v1502_v32 }
 0xc76   :  { %1510 = vrot.lane.b32.xlu1 %v1508_v21, %s2264_s13 }
 0xc7a   :  { %1514 = vrot.lane.b32.xlu1 %v1508_v21, %s2250_s7 }
 0xc92   :  { %v251_v22 = vpop.permute.xlu1 %250 }
 0xc93   :  { %v252_v24 = vsel %vm75_vm6, %v251_v22, %v1670_v9 }
 0xc94   :  { %253 = vrot.lane.b32.xlu1 %v252_v24, %s2248_s5 }
 0xc96   :  { %v83_v26 = vpop.permute.xlu1 %82 }
 0xc97   :  { %v84_v27 = vsel %vm75_vm6, %v83_v26, %v2173_v11 }
 0xc98   :  { %85 = vrot.lane.b32.xlu0 %v84_v27, %s2248_s5  ;;  %94 = vrot.lane.b32.xlu1 %v2173_v11, %s2249_s6 }
 0xce8   :  { %v1511_v57 = vpop.permute.xlu1 %1510 }
 0xce9   :  { %v1513_v52 = vadd.f32 %v1511_v57, %v1502_v32 }
 0xcec   :  { %v1515_v29 = vpop.permute.xlu1 %1514 }
 0xced   :  { %v1517_v30 = vadd.f32 %v1515_v29, %v1513_v52 }
 0xcef   :  { %vm1518_vm14 = vcmp.gt.f32.partialorder %v1517_v30, 0.0 }
 0xcf0   :  { %v1808_v33 = vsel %vm1518_vm14, 1.0, %v2253_v43 }
 0xcf1   :  { %v1521_v38 = vsel %vm2765_vm15, %v1808_v33, 0.0 }
 0xcf2   :  { %1583 = vrot.lane.b32.xlu1 %v1521_v38, %s2249_s6  ;;  %v1572_v15 = vsel %vm46_vm0, %v1521_v38, 0.0 }
 0xd06   :  { %v254_v39 = vpop.permute.xlu1 %253 }
 0xd07   :  { %v255_v41 = vsel %vm75_vm6, %v254_v39, %v1670_v9 }
 0xd08   :  { %v1524_v42 = vsub.f32 1.0, %v255_v41  ;;  %v1523_v54 = vmul.f32 %v255_v41, %v109_v50 }
 0xd0a   :  { %v86_v46 = vpop.permute.xlu0 %85  ;;  %1568 = vrot.lane.b32.xlu1 %v1524_v42, %s2250_s7  ;;  %v95_v47 = vpop.permute.xlu1 %94  ;;  %v1525_v56 = vmul.f32 %v1524_v42, %v109_v50  ;;  %v1535_v37 = vmul.f32 %v1523_v54, %v1523_v54 }
 0xd0b   :  { %v87_v48 = vsel %vm75_vm6, %v86_v46, %v2173_v11  ;;  %vm40_vm6 = vcmp.le.s32.totalorder %v2345_v35, 62 }
 0xd0c   :  { %v97_v49 = vsub.f32 %v87_v48, %v95_v47  ;;  %v1536_v3 = vmul.f32 0.0029761905, %v1535_v37  ;;  %v1565_v7 = vsub.f32 %v2325_v23, %v87_v48  ;;  %v1667_v44 = vsel %vm40_vm6, 1.0, %v2253_v43 }
 0xd0d   :  { %v1668_v23 = vsel %vm2766_vm9, 1.0, %v2253_v43 }
 0xd0e   :  { %v110_v51 = vand.u32 2147483647, %v97_v49  ;;  %v1566_v60 = vmul.f32 %v1565_v7, %v1565_v7 }
 0xd10   :  { %v1522_v55 = vmax.f32 %v110_v51, 0.12  ;;  %v1532_v17 = vsub.f32 %v109_v50, %v110_v51 }
 0xd12   :  { %v1526_v59 = vmul.f32 1.5, %v1522_v55  ;;  %v1533_v0 = vmul.f32 %v1532_v17, %v1532_v17 }
 0xd14   :  { %v1527_v63 = vsub.f32 %v1525_v56, %v1526_v59  ;;  %v1534_v2 = vmul.f32 0.0011904762, %v1533_v0 }
 0xd16   :  { %v1528_v1 = vmax.f32 %v1527_v63, 0.0  ;;  %v1537_v5 = vadd.f32 %v1536_v3, %v1534_v2 }
 0xd18   :  { %v1538_v4 = vmul.f32 %v1528_v1, %v1528_v1 }
 0xd1a   :  { %v1539_v6 = vmul.f32 0.0003968254, %v1538_v4 }
 0xd1c   :  { %v1540_v34 = vadd.f32 %v1539_v6, %v1537_v5 }
 0xd1e   :  { %1542 = vrot.lane.b32.xlu1 %v1540_v34, %s2250_s7 }
 0xd22   :  { %1549 = vrot.lane.b32.xlu1 %v1547_v25, %s2250_s7 }
 0xd64   :  { %v1584_v36 = vpop.permute.xlu1 %1583 }
 0xd65   :  { %v1586_v40 = vmul.f32 %v1584_v36, %v1566_v60 }
 0xd67   :  { %1588 = vrot.lane.b32.xlu1 %v1586_v40, %s2250_s7 }
 0xd7c   :  { %v1569_v28 = vpop.permute.xlu1 %1568 }
 0xd7d   :  { %v1571_v45 = vmul.f32 %v1667_v44, %v1569_v28 }
 0xd7f   :  { %1612 = vrot.lane.b32.xlu0 %v1571_v45, %s2249_s6  ;;  %v1601_v19 = vsel %vm46_vm0, %v1571_v45, 0.0 }
 0xd90   :  { %v1543_v31 = vpop.permute.xlu1 %1542 }
 0xd91   :  { %v1545_v58 = vmul.f32 %v1667_v44, %v1543_v31 }
 0xd93   :  { %v1546_v10 = vadd.f32 %v1545_v58, %v1531_v62 }
 0xd94   :  { %v1550_v53 = vpop.permute.xlu1 %1549 }
 0xd95   :  { %v1552_v8 = vmul.f32 %v1668_v23, %v1550_v53 }
 0xd97   :  { %v1553_v32 = vmul.f32 0.00032258066, %v1552_v8 }
 0xd99   :  { %v1554_v12 = vadd.f32 %v1553_v32, %v1546_v10 }
 0xd9b   :  { %v1555_v13 = vsel %vm46_vm0, %v1554_v12, 0.0 }
 0xd9c   :  { %1556 = vadd.xlane.f32.xlu1 %v1555_v13 }
 0xd9e   :  { %1573 = vadd.xlane.f32.xlu0 %v1572_v15 }
 0xda0   :  { %1602 = vadd.xlane.f32.xlu1 %v1601_v19 }
 0xdd9   :  { %v1589_v16 = vpop.permute.xlu1 %1588 }
 0xdda   :  { %v1591_v35 = vsel %vm46_vm0, %v1589_v16, 0.0 }
 0xddb   :  { %1592 = vadd.xlane.f32.xlu0 %v1591_v35 }
 0xdf1   :  { %v1613_v43 = vpop.permute.xlu0 %1612 }
 0xdf2   :  { %v1615_v18 = vmul.f32 %v1613_v43, %v1566_v60 }
 0xdf4   :  { %1617 = vrot.lane.b32.xlu0 %v1615_v18, %s2250_s7 }
 0xe29   :  { %v1557_v9 = vpop.xlane.xlu1 %1556 }
 0xe2a   :  { %v1558_v11 = vrot.slane %v1557_v9, 4 }
 0xe2b   :  { %v1574_v20 = vpop.xlane.xlu0 %1573 }
 0xe2c   :  { %v1559_v21 = vadd.f32 %v1558_v11, %v1557_v9  ;;  %v1575_v22 = vrot.slane %v1574_v20, 4 }
 0xe2d   :  { %v1603_v39 = vpop.xlane.xlu1 %1602 }
 0xe2e   :  { %v1560_v24 = vrot.slane %v1559_v21, 2  ;;  %v1576_v26 = vadd.f32 %v1575_v22, %v1574_v20  ;;  %v1604_v41 = vrot.slane %v1603_v39, 4 }
 0xe30   :  { %v1577_v27 = vrot.slane %v1576_v26, 2  ;;  %v1561_v57 = vadd.f32 %v1560_v24, %v1559_v21  ;;  %v1605_v42 = vadd.f32 %v1604_v41, %v1603_v39 }
 0xe32   :  { %v1562_v52 = vrot.slane %v1561_v57, 1  ;;  %v1578_v29 = vadd.f32 %v1577_v27, %v1576_v26  ;;  %v1606_v46 = vrot.slane %v1605_v42, 2 }
 0xe34   :  { %v1563_v30 = vadd.f32 %v1562_v52, %v1561_v57  ;;  %v1579_v33 = vrot.slane %v1578_v29, 1  ;;  %v1607_v51 = vadd.f32 %v1606_v46, %v1605_v42 }
 0xe36   :  { %2131 = vpush %v1563_v30  ;;  %v1580_v38 = vadd.f32 %v1579_v33, %v1578_v29  ;;  %v1608_v56 = vrot.slane %v1607_v51, 1 }
 0xe38   :  { %2133 = vpush %v1580_v38  ;;  %v1609_v37 = vadd.f32 %v1608_v56, %v1607_v51 }
 0xe67   :  { %s2737_s14 = spop %2131 }
 0xe68   :  { %v1593_v47 = vpop.xlane.xlu0 %1592 }
 0xe69   :  { %v1594_v48 = vrot.slane %v1593_v47, 4  ;;  %s2739_s15 = spop %2133 }
 0xe6a   :  { %s1631_s19 = smax.f32 %s2265_s18, %s2739_s15  ;;  %p1630_p3 = scmp.gt.f32.partialorder %s2739_s15, 0.0 }
 0xe6b   :  { %v1595_v49 = vadd.f32 %v1594_v48, %v1593_v47  ;;  %v1632_v63 = vstv %s1631_s19 }
 0xe6c   :  { %v1618_v50 = vpop.permute.xlu0 %1617  ;;  %2169 = vrcp.f32 %v1632_v63 }
 0xe6d   :  { %v1596_v54 = vrot.slane %v1595_v49, 2  ;;  %v1620_v55 = vsel %vm46_vm0, %v1618_v50, 0.0  ;;  %vm1649_vm0 = vcmask 0  }
 0xe6e   :  { %1621 = vadd.xlane.f32.xlu1 %v1620_v55 }
 0xe6f   :  { %v1597_v17 = vadd.f32 %v1596_v54, %v1595_v49 }
 0xe71   :  { %v1598_v59 = vrot.slane %v1597_v17, 1 }
 0xe73   :  { %v1599_v0 = vadd.f32 %v1598_v59, %v1597_v17 }
 0xe75   :  { %2135 = vpush %v1599_v0 }
 0xe76   :  { %2137 = vpush %v1609_v37  ;;  %v2170_v7 = vpop.eup %2169 }
 0xea6   :  { %s2136_s16 = spop %2135 }
 0xea7   :  { %s2741_s17 = spop %2137 }
 0xea8   :  { %s1639_s20 = smax.f32 %s2265_s18, %s2741_s17  ;;  %p1638_p4 = scmp.gt.f32.partialorder %s2741_s17, 0.0 }
 0xea9   :  { %v1640_v2 = vstv %s1639_s20 }
 0xeaa   :  { %2171 = vrcp.f32 %v1640_v2 }
 0xeb4   :  { %v2172_v60 = vpop.eup %2171 }
 0xefb   :  { %v1622_v1 = vpop.xlane.xlu1 %1621 }
 0xefc   :  { %v1623_v3 = vrot.slane %v1622_v1, 4 }
 0xefe   :  { %v1624_v4 = vadd.f32 %v1623_v3, %v1622_v1 }
 0xf00   :  { %v1625_v5 = vrot.slane %v1624_v4, 2 }
 0xf02   :  { %v1626_v6 = vadd.f32 %v1625_v5, %v1624_v4 }
 0xf04   :  { %v1627_v34 = vrot.slane %v1626_v6, 1 }
 0xf06   :  { %v1628_v25 = vadd.f32 %v1627_v34, %v1626_v6 }
 0xf08   :  { %2139 = vpush %v1628_v25 }
 0xf09   :  { %2141 = vpush %v2170_v7 }
 0xf0a   :  { %2143 = vpush %v2172_v60 }
 0xf39   :  { %s2140_s21 = spop %2139 }
 0xf3a   :  { %s2142_s22 = spop %2141 }
 0xf3b   :  { %s1635_s23 = smul.f32 %s2142_s22, %s2136_s16  ;;  %s2144_s24 = spop %2143 }
 0xf3c   :  { %s1643_s25 = smul.f32 %s2144_s24, %s2140_s21 }
 0xf3d   :  { %s1636_s26 = smul.f32 4.0, %s1635_s23 }
 0xf3e   :  { %s1644_s27 = smul.f32 0.5, %s1643_s25 }
 0xf3f   :  { %s2768_s26 = smov (!%p1630_p3, %s1636_s26), 0.0 }
 0xf40   :  { %s2770_s27 = smov (!%p1638_p4, %s1644_s27), 0.0  ;;  %s1646_s28 = sadd.f32 %s2737_s14, %s2768_s26 }
 0xf42   :  { %s1647_s0 = sadd.f32 %s1646_s28, %s2770_s27 }
 0xf44   :  { %v1648_v36 = vstv %s1647_s0 }
 0xf45   :  { %1650 = vst.msk [vmem:[#allocation7] sm:$0x1] %vm1649_vm0, %v1648_v36 }
 0xf46   :  { %2229 = shalt.err (!%p2226_p9)
}
 0xf47   :  { %s2230_s6 = scalar_lea.hbm %s2762_s2, 16 }
 0xf48   :  { %p2231_p10 = scmp.ne.s32.totalorder %s2762_s2, %s2230_s6  ;;  %p2234_p11 = scmp.lt.u32.totalorder %s2230_s6, %s2762_s2 }
 0xf4a   :  { %p2236_p12 = pnand %p2234_p11, %p2231_p10 }
 0xf4c   :  { %2239 = shalt.err (!%p2236_p12)
}
 0xf4d   :  { %1660 = dma.vmem_to_hbm [thread:$0]  %s1658_s30, 16, %s2762_s2, [#allocation4]  }
 0xf4e   :  { %2244 = dma.done.wait [#allocation4], 16  }
 0xf4f   :  { %2245 = vsyncadd [#allocation4], 4294967280 }
 0xf50   :  { %1664 = vsyncpa [#allocation3], 1 }
 0xf51   :  { %1665 = vsyncpa [#allocation6], 1 }
 0xf52   :  { %1666 = vsyncpa [#allocation4], 1 }

</bundles_post_ra>
